<compile_context>
chip_gen: v5e
topology: v5e:2x2
jax: 0.10.0
libtpu: 0.0.40
codegen_flags: <defaults>
</compile_context>

<pallas_src>
import jax
import jax.numpy as jnp
from jax.experimental import pallas as pl
from jax.experimental.pallas import tpu as pltpu

# ---------------- config (small, consistent with the module) ----------------
BATCH = 8          # batch_size (== number of masked positions)
SEQ = 8            # max_seq_len (node num)
EMB = 128          # hidden_size
VOC = 256          # vocab_size
N_REL = 8          # num_relations
E_SOFT = 0.8       # entity_soft_label
R_SOFT = 1.0       # relation_soft_label
EPS_LN1 = 1e-12    # layer_norm1 eps (matches torch module)
EPS_LN2 = 1e-7     # layer_norm2 eps (matches torch module)


# ---------------------------- in-kernel helpers -----------------------------
def _erf(x):
    # Abramowitz & Stegun 7.1.26 (|err| < 1.5e-7) == exact GELU to ~f32 precision.
    # NOTE: TPUs have no hardware erf; lax.erf would decompose to similar VPU
    # work and its Mosaic lowering is not guaranteed, so keep the explicit
    # polynomial (the single exp below still lands on the EUP slot).
    a1, a2, a3, a4, a5 = 0.254829592, -0.284496736, 1.421413741, -1.453152027, 1.061405429
    p = 0.3275911
    s = jnp.where(x >= 0.0, 1.0, -1.0)
    ax = jnp.abs(x)
    t = 1.0 / (1.0 + p * ax)
    poly = ((((a5 * t + a4) * t + a3) * t + a2) * t + a1) * t
    return s * (1.0 - poly * jnp.exp(-ax * ax))


def _gelu_exact(x):
    return x * 0.5 * (1.0 + _erf(x * 0.7071067811865476))


# ------------------------------- fused kernel --------------------------------
def fused_forward_kernel(
        ids_ref, pos_ref, lab_ref, typ_ref,                 # SMEM scalar-prefetch
        emb_ref, ln1g_ref, ln1b_ref, w1t_ref, b1_ref,
        ln2g_ref, ln2b_ref, embT_ref, b2_ref,               # VMEM inputs
        fcout_ref, loss_ref,                                # outputs (VMEM, SMEM)
        gat_ref):                                           # VMEM scratch (B, E)
    # -- 1) in-kernel gather of the masked-position embedding rows ------------
    # encoder == identity => enc_out[b, mask_pos[b]] == node_emb[input_ids[b, mask_pos[b]]]
    for b in range(BATCH):                                  # B tiny & static -> unrolled
        pos = pos_ref[b]
        tok = ids_ref[b, pos]
        gat_ref[pl.ds(b, 1), :] = emb_ref[pl.ds(tok, 1), :]
    x = gat_ref[...]                                        # (B, E) f32

    # -- 2) LayerNorm1 (eps 1e-12), only on the B gathered rows ---------------
    mu1 = jnp.mean(x, axis=-1, keepdims=True)
    var1 = jnp.mean((x - mu1) ** 2, axis=-1, keepdims=True)
    x = (x - mu1) * jax.lax.rsqrt(var1 + EPS_LN1) * ln1g_ref[...] + ln1b_ref[...]
    # hidden_dropout_prob == 0.0 -> dropout is identity.

    # -- 3) broadcast per-row SMEM scalars to (B,1) columns (branch-free selects)
    row = jax.lax.broadcasted_iota(jnp.int32, (BATCH, 1), 0)
    mtype = jnp.zeros((BATCH, 1), jnp.float32)              # mask_type in {-1,+1}
    label = jnp.zeros((BATCH, 1), jnp.int32)
    for b in range(BATCH):
        mtype = jnp.where(row == b, typ_ref[b].astype(jnp.float32), mtype)
        label = jnp.where(row == b, lab_ref[b], label)

    # -- 4) fc1 -> exact GELU -> LayerNorm2 (eps 1e-7) -------------------------
    # bf16 operands / f32 accumulation: native MXU path on v6e/v7x, still fine
    # on v5e's 4x128x128 MXU (K=N=128 already matched; underfill is only M=B).
    z = jnp.dot(x.astype(jnp.bfloat16), w1t_ref[...].astype(jnp.bfloat16),
                preferred_element_type=jnp.float32) + b1_ref[...]
    g = _gelu_exact(z)
    mu2 = jnp.mean(g, axis=-1, keepdims=True)
    var2 = jnp.mean((g - mu2) ** 2, axis=-1, keepdims=True)
    y = (g - mu2) * jax.lax.rsqrt(var2 + EPS_LN2) * ln2g_ref[...] + ln2b_ref[...]

    # -- 5) tied-embedding projection: (B,E) @ (E,V) + (1,V) -------------------
    logits = jnp.dot(y.astype(jnp.bfloat16), embT_ref[...].astype(jnp.bfloat16),
                     preferred_element_type=jnp.float32) + b2_ref[...]

    # -- 6) type mask + soft-label cross-entropy -------------------------------
    col = jax.lax.broadcasted_iota(jnp.int32, (BATCH, VOC), 1)
    # type_indicator = relu(cat([special(-1), relation(-1)*mt, entity(+1)*mt]))
    base = jnp.where(col < 2, -1.0,
                     jnp.where(col < 2 + N_REL, -mtype, mtype))
    ti = jnp.maximum(base, 0.0)
    fc_out = logits + 1.0e6 * (ti - 1.0)
    fcout_ref[...] = fc_out                                 # (B, V) lane-dense

    one_hot = (col == label).astype(jnp.float32)
    ti2 = ti - one_hot
    num_cand = jnp.sum(ti2, axis=-1, keepdims=True)
    soft = ((1.0 + mtype) * E_SOFT + (1.0 - mtype) * R_SOFT) * 0.5
    soft_labels = soft * one_hot + (1.0 - soft) * ti2 * (1.0 / num_cand)

    # softmax cross-entropy with soft labels, reduced to a scalar in-kernel
    m = jnp.max(fc_out, axis=-1, keepdims=True)
    lse = m + jnp.log(jnp.sum(jnp.exp(fc_out - m), axis=-1, keepdims=True))
    per_loss = -jnp.sum(soft_labels * (fc_out - lse), axis=-1, keepdims=True)  # (B,1)
    loss_ref[0, 0] = jnp.sum(per_loss) * (1.0 / BATCH)


# ------------------------------ model wrapper --------------------------------
def trunc_normal(key, shape, std=0.02):
    return std * jax.random.truncated_normal(key, -2.0, 2.0, shape, dtype=jnp.float32)


def init_params(key):
    k0, k1 = jax.random.split(key)
    node_emb = trunc_normal(k0, (VOC, EMB))                 # embedding table (V, E)
    fc1_w = trunc_normal(k1, (EMB, EMB))                    # torch Linear weight (out, in)
    return {
        "node_emb": node_emb,                               # (V, E) for the row gather
        "node_emb_T": jnp.asarray(node_emb.T),              # (E, V) pre-transposed (tied proj.)
        "ln1_g": jnp.ones((1, EMB), jnp.float32),
        "ln1_b": jnp.zeros((1, EMB), jnp.float32),
        "fc1_wT": jnp.asarray(fc1_w.T),                     # (in, out) pre-transposed
        "fc1_b": jnp.zeros((1, EMB), jnp.float32),
        "ln2_g": jnp.ones((1, EMB), jnp.float32),
        "ln2_b": jnp.zeros((1, EMB), jnp.float32),
        "fc2_b": jnp.zeros((1, VOC), jnp.float32),
    }


@jax.jit
def hypergraph_forward(params, input_ids, mask_pos, mask_label, mask_type):
    # TODO(synk): the hypergraph `encoder` class is not provided in the reference
    # module source; the local encoder is treated as identity, which is what lets
    # the whole (embedding -> LN1 -> head -> loss) path fuse into one pallas_call.
    grid_spec = pltpu.PrefetchScalarGridSpec(
        num_scalar_prefetch=4,                              # ids, pos, label, type -> SMEM
        grid=(1,),
        in_specs=[
            pl.BlockSpec((VOC, EMB), lambda i, *_: (0, 0)),   # node_emb (row gather)
            pl.BlockSpec((1, EMB), lambda i, *_: (0, 0)),     # ln1 gamma
            pl.BlockSpec((1, EMB), lambda i, *_: (0, 0)),     # ln1 beta
            pl.BlockSpec((EMB, EMB), lambda i, *_: (0, 0)),   # fc1.weight^T (pre-transposed)
            pl.BlockSpec((1, EMB), lambda i, *_: (0, 0)),     # fc1 bias
            pl.BlockSpec((1, EMB), lambda i, *_: (0, 0)),     # ln2 gamma
            pl.BlockSpec((1, EMB), lambda i, *_: (0, 0)),     # ln2 beta
            pl.BlockSpec((EMB, VOC), lambda i, *_: (0, 0)),   # node_emb^T (pre-transposed)
            pl.BlockSpec((1, VOC), lambda i, *_: (0, 0)),     # fc2 bias
        ],
        out_specs=[
            pl.BlockSpec((BATCH, VOC), lambda i, *_: (0, 0)), # fc_out (lane-dense V=256)
            pl.BlockSpec(memory_space=pltpu.MemorySpace.SMEM),  # scalar loss
        ],
        scratch_shapes=[pltpu.VMEM((BATCH, EMB), jnp.float32)],  # gathered rows
    )
    fc_out, loss11 = pl.pallas_call(
        fused_forward_kernel,
        grid_spec=grid_spec,
        out_shape=(jax.ShapeDtypeStruct((BATCH, VOC), jnp.float32),
                   jax.ShapeDtypeStruct((1, 1), jnp.float32)),
        # grid=(1,): overhead-bound at B=8. If BATCH grows, add a row-tiled
        # leading grid axis marked "parallel" so v7x's two TensorCores share it.
        compiler_params=pltpu.CompilerParams(dimension_semantics=("arbitrary",)),
    )(input_ids.astype(jnp.int32), mask_pos.astype(jnp.int32),
      mask_label.astype(jnp.int32), mask_type.astype(jnp.int32),
      params["node_emb"], params["ln1_g"], params["ln1_b"],
      params["fc1_wT"], params["fc1_b"], params["ln2_g"], params["ln2_b"],
      params["node_emb_T"], params["fc2_b"])

    loss = loss11[0, 0]                                     # use_decoder=False -> only CE loss
    return loss, fc_out


# ----------------------------------- main ------------------------------------
if __name__ == "__main__":
    root = jax.random.PRNGKey(0)
    kp, kid, kpos, kml, kmt = jax.random.split(root, 5)

    params = init_params(kp)

    input_ids = jax.random.randint(kid, (BATCH, SEQ), 0, VOC, dtype=jnp.int32)
    mask_pos = jax.random.randint(kpos, (BATCH,), 0, SEQ, dtype=jnp.int32)
    # mask_type in {-1 (relation), +1 (entity)}; labels drawn from matching range
    mask_type = jnp.where(jax.random.bernoulli(kmt, 0.5, (BATCH,)), 1.0, -1.0).astype(jnp.float32)
    ent_lab = jax.random.randint(kml, (BATCH,), 2 + N_REL, VOC, dtype=jnp.int32)
    rel_lab = jax.random.randint(kml, (BATCH,), 2, 2 + N_REL, dtype=jnp.int32)
    mask_label = jnp.where(mask_type > 0, ent_lab, rel_lab).astype(jnp.int32)

    loss, fc_out = hypergraph_forward(params, input_ids, mask_pos, mask_label, mask_type)
    jax.block_until_ready((loss, fc_out))

    assert fc_out.shape == (BATCH, VOC)
    assert bool(jnp.isfinite(loss))
    print("KERNEL_OK")
</pallas_src>

<mosaic_0001>
module attributes {stable_mosaic.version = 11 : i64} {
  func.func @fused_forward_kernel(%arg0: i32, %arg1: memref<8x8xi32, #tpu.memory_space<smem>>, %arg2: memref<8xi32, #tpu.memory_space<smem>>, %arg3: memref<8xi32, #tpu.memory_space<smem>>, %arg4: memref<8xi32, #tpu.memory_space<smem>>, %arg5: memref<256x128xf32, #tpu.memory_space<vmem>>, %arg6: memref<1x128xf32, #tpu.memory_space<vmem>>, %arg7: memref<1x128xf32, #tpu.memory_space<vmem>>, %arg8: memref<128x128xf32, #tpu.memory_space<vmem>>, %arg9: memref<1x128xf32, #tpu.memory_space<vmem>>, %arg10: memref<1x128xf32, #tpu.memory_space<vmem>>, %arg11: memref<1x128xf32, #tpu.memory_space<vmem>>, %arg12: memref<128x256xf32, #tpu.memory_space<vmem>>, %arg13: memref<1x256xf32, #tpu.memory_space<vmem>>, %arg14: memref<8x256xf32, #tpu.memory_space<vmem>>, %arg15: memref<1x1xf32, #tpu.memory_space<smem>>, %arg16: memref<8x128xf32, #tpu.memory_space<vmem>>) attributes {dimension_semantics = [#tpu.dimension_semantics<arbitrary>], iteration_bounds = array<i64: 1>, scalar_prefetch = 4 : i64, scratch_operands = 1 : i64, tpu.core_type = #tpu.core_type<tc>, window_params = [{pipeline_mode = #tpu.pipeline_mode<synchronous>, transform_indices = @transform_0, window_bounds = array<i64: 256, 128>}, {pipeline_mode = #tpu.pipeline_mode<synchronous>, transform_indices = @transform_1, window_bounds = array<i64: 1, 128>}, {pipeline_mode = #tpu.pipeline_mode<synchronous>, transform_indices = @transform_2, window_bounds = array<i64: 1, 128>}, {pipeline_mode = #tpu.pipeline_mode<synchronous>, transform_indices = @transform_3, window_bounds = array<i64: 128, 128>}, {pipeline_mode = #tpu.pipeline_mode<synchronous>, transform_indices = @transform_4, window_bounds = array<i64: 1, 128>}, {pipeline_mode = #tpu.pipeline_mode<synchronous>, transform_indices = @transform_5, window_bounds = array<i64: 1, 128>}, {pipeline_mode = #tpu.pipeline_mode<synchronous>, transform_indices = @transform_6, window_bounds = array<i64: 1, 128>}, {pipeline_mode = #tpu.pipeline_mode<synchronous>, transform_indices = @transform_7, window_bounds = array<i64: 128, 256>}, {pipeline_mode = #tpu.pipeline_mode<synchronous>, transform_indices = @transform_8, window_bounds = array<i64: 1, 256>}, {pipeline_mode = #tpu.pipeline_mode<synchronous>, transform_indices = @transform_9, window_bounds = array<i64: 8, 256>}, {transform_indices = @transform_10, window_bounds = array<i64: 1, 1>}]} {
    %c0 = arith.constant 0 : index
    %0 = memref.load %arg2[%c0] : memref<8xi32, #tpu.memory_space<smem>>
    %c0_0 = arith.constant 0 : index
    %1 = arith.index_cast %0 : i32 to index
    %2 = memref.load %arg1[%c0_0, %1] : memref<8x8xi32, #tpu.memory_space<smem>>
    %3 = arith.index_cast %2 : i32 to index
    %c0_1 = arith.constant 0 : index
    %4 = vector.load %arg5[%3, %c0_1] : memref<256x128xf32, #tpu.memory_space<vmem>>, vector<1x128xf32>
    %c0_2 = arith.constant 0 : index
    %c0_3 = arith.constant 0 : index
    %5 = vector.load %arg16[%c0_2, %c0_3] : memref<8x128xf32, #tpu.memory_space<vmem>>, vector<1x128xf32>
    tpu.vector_store %arg16[%c0_2, %c0_3], %4 {strides = array<i32>} : memref<8x128xf32, #tpu.memory_space<vmem>>, vector<1x128xf32>,
    %c1 = arith.constant 1 : index
    %6 = memref.load %arg2[%c1] : memref<8xi32, #tpu.memory_space<smem>>
    %c1_4 = arith.constant 1 : index
    %7 = arith.index_cast %6 : i32 to index
    %8 = memref.load %arg1[%c1_4, %7] : memref<8x8xi32, #tpu.memory_space<smem>>
    %9 = arith.index_cast %8 : i32 to index
    %c0_5 = arith.constant 0 : index
    %10 = vector.load %arg5[%9, %c0_5] : memref<256x128xf32, #tpu.memory_space<vmem>>, vector<1x128xf32>
    %c1_6 = arith.constant 1 : index
    %c0_7 = arith.constant 0 : index
    %11 = vector.load %arg16[%c1_6, %c0_7] : memref<8x128xf32, #tpu.memory_space<vmem>>, vector<1x128xf32>
    tpu.vector_store %arg16[%c1_6, %c0_7], %10 {strides = array<i32>} : memref<8x128xf32, #tpu.memory_space<vmem>>, vector<1x128xf32>,
    %c2 = arith.constant 2 : index
    %12 = memref.load %arg2[%c2] : memref<8xi32, #tpu.memory_space<smem>>
    %c2_8 = arith.constant 2 : index
    %13 = arith.index_cast %12 : i32 to index
    %14 = memref.load %arg1[%c2_8, %13] : memref<8x8xi32, #tpu.memory_space<smem>>
    %15 = arith.index_cast %14 : i32 to index
    %c0_9 = arith.constant 0 : index
    %16 = vector.load %arg5[%15, %c0_9] : memref<256x128xf32, #tpu.memory_space<vmem>>, vector<1x128xf32>
    %c2_10 = arith.constant 2 : index
    %c0_11 = arith.constant 0 : index
    %17 = vector.load %arg16[%c2_10, %c0_11] : memref<8x128xf32, #tpu.memory_space<vmem>>, vector<1x128xf32>
    tpu.vector_store %arg16[%c2_10, %c0_11], %16 {strides = array<i32>} : memref<8x128xf32, #tpu.memory_space<vmem>>, vector<1x128xf32>,
    %c3 = arith.constant 3 : index
    %18 = memref.load %arg2[%c3] : memref<8xi32, #tpu.memory_space<smem>>
    %c3_12 = arith.constant 3 : index
    %19 = arith.index_cast %18 : i32 to index
    %20 = memref.load %arg1[%c3_12, %19] : memref<8x8xi32, #tpu.memory_space<smem>>
    %21 = arith.index_cast %20 : i32 to index
    %c0_13 = arith.constant 0 : index
    %22 = vector.load %arg5[%21, %c0_13] : memref<256x128xf32, #tpu.memory_space<vmem>>, vector<1x128xf32>
    %c3_14 = arith.constant 3 : index
    %c0_15 = arith.constant 0 : index
    %23 = vector.load %arg16[%c3_14, %c0_15] : memref<8x128xf32, #tpu.memory_space<vmem>>, vector<1x128xf32>
    tpu.vector_store %arg16[%c3_14, %c0_15], %22 {strides = array<i32>} : memref<8x128xf32, #tpu.memory_space<vmem>>, vector<1x128xf32>,
    %c4 = arith.constant 4 : index
    %24 = memref.load %arg2[%c4] : memref<8xi32, #tpu.memory_space<smem>>
    %c4_16 = arith.constant 4 : index
    %25 = arith.index_cast %24 : i32 to index
    %26 = memref.load %arg1[%c4_16, %25] : memref<8x8xi32, #tpu.memory_space<smem>>
    %27 = arith.index_cast %26 : i32 to index
    %c0_17 = arith.constant 0 : index
    %28 = vector.load %arg5[%27, %c0_17] : memref<256x128xf32, #tpu.memory_space<vmem>>, vector<1x128xf32>
    %c4_18 = arith.constant 4 : index
    %c0_19 = arith.constant 0 : index
    %29 = vector.load %arg16[%c4_18, %c0_19] : memref<8x128xf32, #tpu.memory_space<vmem>>, vector<1x128xf32>
    tpu.vector_store %arg16[%c4_18, %c0_19], %28 {strides = array<i32>} : memref<8x128xf32, #tpu.memory_space<vmem>>, vector<1x128xf32>,
    %c5 = arith.constant 5 : index
    %30 = memref.load %arg2[%c5] : memref<8xi32, #tpu.memory_space<smem>>
    %c5_20 = arith.constant 5 : index
    %31 = arith.index_cast %30 : i32 to index
    %32 = memref.load %arg1[%c5_20, %31] : memref<8x8xi32, #tpu.memory_space<smem>>
    %33 = arith.index_cast %32 : i32 to index
    %c0_21 = arith.constant 0 : index
    %34 = vector.load %arg5[%33, %c0_21] : memref<256x128xf32, #tpu.memory_space<vmem>>, vector<1x128xf32>
    %c5_22 = arith.constant 5 : index
    %c0_23 = arith.constant 0 : index
    %35 = vector.load %arg16[%c5_22, %c0_23] : memref<8x128xf32, #tpu.memory_space<vmem>>, vector<1x128xf32>
    tpu.vector_store %arg16[%c5_22, %c0_23], %34 {strides = array<i32>} : memref<8x128xf32, #tpu.memory_space<vmem>>, vector<1x128xf32>,
    %c6 = arith.constant 6 : index
    %36 = memref.load %arg2[%c6] : memref<8xi32, #tpu.memory_space<smem>>
    %c6_24 = arith.constant 6 : index
    %37 = arith.index_cast %36 : i32 to index
    %38 = memref.load %arg1[%c6_24, %37] : memref<8x8xi32, #tpu.memory_space<smem>>
    %39 = arith.index_cast %38 : i32 to index
    %c0_25 = arith.constant 0 : index
    %40 = vector.load %arg5[%39, %c0_25] : memref<256x128xf32, #tpu.memory_space<vmem>>, vector<1x128xf32>
    %c6_26 = arith.constant 6 : index
    %c0_27 = arith.constant 0 : index
    %41 = vector.load %arg16[%c6_26, %c0_27] : memref<8x128xf32, #tpu.memory_space<vmem>>, vector<1x128xf32>
    tpu.vector_store %arg16[%c6_26, %c0_27], %40 {strides = array<i32>} : memref<8x128xf32, #tpu.memory_space<vmem>>, vector<1x128xf32>,
    %c7 = arith.constant 7 : index
    %42 = memref.load %arg2[%c7] : memref<8xi32, #tpu.memory_space<smem>>
    %c7_28 = arith.constant 7 : index
    %43 = arith.index_cast %42 : i32 to index
    %44 = memref.load %arg1[%c7_28, %43] : memref<8x8xi32, #tpu.memory_space<smem>>
    %45 = arith.index_cast %44 : i32 to index
    %c0_29 = arith.constant 0 : index
    %46 = vector.load %arg5[%45, %c0_29] : memref<256x128xf32, #tpu.memory_space<vmem>>, vector<1x128xf32>
    %c7_30 = arith.constant 7 : index
    %c0_31 = arith.constant 0 : index
    %47 = vector.load %arg16[%c7_30, %c0_31] : memref<8x128xf32, #tpu.memory_space<vmem>>, vector<1x128xf32>
    tpu.vector_store %arg16[%c7_30, %c0_31], %46 {strides = array<i32>} : memref<8x128xf32, #tpu.memory_space<vmem>>, vector<1x128xf32>,
    %c0_32 = arith.constant 0 : index
    %c0_33 = arith.constant 0 : index
    %48 = vector.load %arg16[%c0_32, %c0_33] : memref<8x128xf32, #tpu.memory_space<vmem>>, vector<8x128xf32>
    %cst = arith.constant dense<0.000000e+00> : vector<8xf32>
    %49 = vector.multi_reduction <add>, %48, %cst [1] : vector<8x128xf32> to vector<8xf32>
    %50 = vector.shape_cast %49 : vector<8xf32> to vector<8x1xf32>
    %cst_34 = arith.constant 1.280000e+02 : f32
    %51 = vector.broadcast %cst_34 : f32 to vector<8x1xf32>
    %52 = arith.divf %50, %51 : vector<8x1xf32>
    %53 = vector.broadcast %52 : vector<8x1xf32> to vector<8x128xf32>
    %54 = arith.subf %48, %53 : vector<8x128xf32>
    %55 = arith.mulf %54, %54 : vector<8x128xf32>
    %cst_35 = arith.constant dense<0.000000e+00> : vector<8xf32>
    %56 = vector.multi_reduction <add>, %55, %cst_35 [1] : vector<8x128xf32> to vector<8xf32>
    %57 = vector.shape_cast %56 : vector<8xf32> to vector<8x1xf32>
    %cst_36 = arith.constant 1.280000e+02 : f32
    %58 = vector.broadcast %cst_36 : f32 to vector<8x1xf32>
    %59 = arith.divf %57, %58 : vector<8x1xf32>
    %60 = vector.broadcast %52 : vector<8x1xf32> to vector<8x128xf32>
    %61 = arith.subf %48, %60 : vector<8x128xf32>
    %cst_37 = arith.constant 9.99999996E-13 : f32
    %62 = vector.broadcast %cst_37 : f32 to vector<8x1xf32>
    %63 = arith.addf %59, %62 : vector<8x1xf32>
    %64 = math.rsqrt %63 : vector<8x1xf32>
    %65 = vector.broadcast %64 : vector<8x1xf32> to vector<8x128xf32>
    %66 = arith.mulf %61, %65 : vector<8x128xf32>
    %c0_38 = arith.constant 0 : index
    %c0_39 = arith.constant 0 : index
    %67 = vector.load %arg6[%c0_38, %c0_39] : memref<1x128xf32, #tpu.memory_space<vmem>>, vector<1x128xf32>
    %68 = vector.broadcast %67 : vector<1x128xf32> to vector<8x128xf32>
    %69 = arith.mulf %66, %68 : vector<8x128xf32>
    %c0_40 = arith.constant 0 : index
    %c0_41 = arith.constant 0 : index
    %70 = vector.load %arg7[%c0_40, %c0_41] : memref<1x128xf32, #tpu.memory_space<vmem>>, vector<1x128xf32>
    %71 = vector.broadcast %70 : vector<1x128xf32> to vector<8x128xf32>
    %72 = arith.addf %69, %71 : vector<8x128xf32>
    %73 = tpu.iota {dimensions = array<i32: 0>} : vector<8x1xi32>
    %cst_42 = arith.constant 0.000000e+00 : f32
    %74 = vector.broadcast %cst_42 : f32 to vector<8x1xf32>
    %c0_i32 = arith.constant 0 : i32
    %75 = vector.broadcast %c0_i32 : i32 to vector<8x1xi32>
    %c0_i32_43 = arith.constant 0 : i32
    %76 = vector.broadcast %c0_i32_43 : i32 to vector<8x1xi32>
    %77 = arith.cmpi eq, %73, %76 : vector<8x1xi32>
    %c0_44 = arith.constant 0 : index
    %78 = memref.load %arg4[%c0_44] : memref<8xi32, #tpu.memory_space<smem>>
    %79 = arith.sitofp %78 : i32 to f32
    %80 = vector.broadcast %79 : f32 to vector<8x1xf32>
    %81 = arith.select %77, %80, %74 : vector<8x1xi1>, vector<8x1xf32>
    %c0_i32_45 = arith.constant 0 : i32
    %82 = vector.broadcast %c0_i32_45 : i32 to vector<8x1xi32>
    %83 = arith.cmpi eq, %73, %82 : vector<8x1xi32>
    %c0_46 = arith.constant 0 : index
    %84 = memref.load %arg3[%c0_46] : memref<8xi32, #tpu.memory_space<smem>>
    %85 = vector.broadcast %84 : i32 to vector<8x1xi32>
    %86 = arith.select %83, %85, %75 : vector<8x1xi1>, vector<8x1xi32>
    %c1_i32 = arith.constant 1 : i32
    %87 = vector.broadcast %c1_i32 : i32 to vector<8x1xi32>
    %88 = arith.cmpi eq, %73, %87 : vector<8x1xi32>
    %c1_47 = arith.constant 1 : index
    %89 = memref.load %arg4[%c1_47] : memref<8xi32, #tpu.memory_space<smem>>
    %90 = arith.sitofp %89 : i32 to f32
    %91 = vector.broadcast %90 : f32 to vector<8x1xf32>
    %92 = arith.select %88, %91, %81 : vector<8x1xi1>, vector<8x1xf32>
    %c1_i32_48 = arith.constant 1 : i32
    %93 = vector.broadcast %c1_i32_48 : i32 to vector<8x1xi32>
    %94 = arith.cmpi eq, %73, %93 : vector<8x1xi32>
    %c1_49 = arith.constant 1 : index
    %95 = memref.load %arg3[%c1_49] : memref<8xi32, #tpu.memory_space<smem>>
    %96 = vector.broadcast %95 : i32 to vector<8x1xi32>
    %97 = arith.select %94, %96, %86 : vector<8x1xi1>, vector<8x1xi32>
    %c2_i32 = arith.constant 2 : i32
    %98 = vector.broadcast %c2_i32 : i32 to vector<8x1xi32>
    %99 = arith.cmpi eq, %73, %98 : vector<8x1xi32>
    %c2_50 = arith.constant 2 : index
    %100 = memref.load %arg4[%c2_50] : memref<8xi32, #tpu.memory_space<smem>>
    %101 = arith.sitofp %100 : i32 to f32
    %102 = vector.broadcast %101 : f32 to vector<8x1xf32>
    %103 = arith.select %99, %102, %92 : vector<8x1xi1>, vector<8x1xf32>
    %c2_i32_51 = arith.constant 2 : i32
    %104 = vector.broadcast %c2_i32_51 : i32 to vector<8x1xi32>
    %105 = arith.cmpi eq, %73, %104 : vector<8x1xi32>
    %c2_52 = arith.constant 2 : index
    %106 = memref.load %arg3[%c2_52] : memref<8xi32, #tpu.memory_space<smem>>
    %107 = vector.broadcast %106 : i32 to vector<8x1xi32>
    %108 = arith.select %105, %107, %97 : vector<8x1xi1>, vector<8x1xi32>
    %c3_i32 = arith.constant 3 : i32
    %109 = vector.broadcast %c3_i32 : i32 to vector<8x1xi32>
    %110 = arith.cmpi eq, %73, %109 : vector<8x1xi32>
    %c3_53 = arith.constant 3 : index
    %111 = memref.load %arg4[%c3_53] : memref<8xi32, #tpu.memory_space<smem>>
    %112 = arith.sitofp %111 : i32 to f32
    %113 = vector.broadcast %112 : f32 to vector<8x1xf32>
    %114 = arith.select %110, %113, %103 : vector<8x1xi1>, vector<8x1xf32>
    %c3_i32_54 = arith.constant 3 : i32
    %115 = vector.broadcast %c3_i32_54 : i32 to vector<8x1xi32>
    %116 = arith.cmpi eq, %73, %115 : vector<8x1xi32>
    %c3_55 = arith.constant 3 : index
    %117 = memref.load %arg3[%c3_55] : memref<8xi32, #tpu.memory_space<smem>>
    %118 = vector.broadcast %117 : i32 to vector<8x1xi32>
    %119 = arith.select %116, %118, %108 : vector<8x1xi1>, vector<8x1xi32>
    %c4_i32 = arith.constant 4 : i32
    %120 = vector.broadcast %c4_i32 : i32 to vector<8x1xi32>
    %121 = arith.cmpi eq, %73, %120 : vector<8x1xi32>
    %c4_56 = arith.constant 4 : index
    %122 = memref.load %arg4[%c4_56] : memref<8xi32, #tpu.memory_space<smem>>
    %123 = arith.sitofp %122 : i32 to f32
    %124 = vector.broadcast %123 : f32 to vector<8x1xf32>
    %125 = arith.select %121, %124, %114 : vector<8x1xi1>, vector<8x1xf32>
    %c4_i32_57 = arith.constant 4 : i32
    %126 = vector.broadcast %c4_i32_57 : i32 to vector<8x1xi32>
    %127 = arith.cmpi eq, %73, %126 : vector<8x1xi32>
    %c4_58 = arith.constant 4 : index
    %128 = memref.load %arg3[%c4_58] : memref<8xi32, #tpu.memory_space<smem>>
    %129 = vector.broadcast %128 : i32 to vector<8x1xi32>
    %130 = arith.select %127, %129, %119 : vector<8x1xi1>, vector<8x1xi32>
    %c5_i32 = arith.constant 5 : i32
    %131 = vector.broadcast %c5_i32 : i32 to vector<8x1xi32>
    %132 = arith.cmpi eq, %73, %131 : vector<8x1xi32>
    %c5_59 = arith.constant 5 : index
    %133 = memref.load %arg4[%c5_59] : memref<8xi32, #tpu.memory_space<smem>>
    %134 = arith.sitofp %133 : i32 to f32
    %135 = vector.broadcast %134 : f32 to vector<8x1xf32>
    %136 = arith.select %132, %135, %125 : vector<8x1xi1>, vector<8x1xf32>
    %c5_i32_60 = arith.constant 5 : i32
    %137 = vector.broadcast %c5_i32_60 : i32 to vector<8x1xi32>
    %138 = arith.cmpi eq, %73, %137 : vector<8x1xi32>
    %c5_61 = arith.constant 5 : index
    %139 = memref.load %arg3[%c5_61] : memref<8xi32, #tpu.memory_space<smem>>
    %140 = vector.broadcast %139 : i32 to vector<8x1xi32>
    %141 = arith.select %138, %140, %130 : vector<8x1xi1>, vector<8x1xi32>
    %c6_i32 = arith.constant 6 : i32
    %142 = vector.broadcast %c6_i32 : i32 to vector<8x1xi32>
    %143 = arith.cmpi eq, %73, %142 : vector<8x1xi32>
    %c6_62 = arith.constant 6 : index
    %144 = memref.load %arg4[%c6_62] : memref<8xi32, #tpu.memory_space<smem>>
    %145 = arith.sitofp %144 : i32 to f32
    %146 = vector.broadcast %145 : f32 to vector<8x1xf32>
    %147 = arith.select %143, %146, %136 : vector<8x1xi1>, vector<8x1xf32>
    %c6_i32_63 = arith.constant 6 : i32
    %148 = vector.broadcast %c6_i32_63 : i32 to vector<8x1xi32>
    %149 = arith.cmpi eq, %73, %148 : vector<8x1xi32>
    %c6_64 = arith.constant 6 : index
    %150 = memref.load %arg3[%c6_64] : memref<8xi32, #tpu.memory_space<smem>>
    %151 = vector.broadcast %150 : i32 to vector<8x1xi32>
    %152 = arith.select %149, %151, %141 : vector<8x1xi1>, vector<8x1xi32>
    %c7_i32 = arith.constant 7 : i32
    %153 = vector.broadcast %c7_i32 : i32 to vector<8x1xi32>
    %154 = arith.cmpi eq, %73, %153 : vector<8x1xi32>
    %c7_65 = arith.constant 7 : index
    %155 = memref.load %arg4[%c7_65] : memref<8xi32, #tpu.memory_space<smem>>
    %156 = arith.sitofp %155 : i32 to f32
    %157 = vector.broadcast %156 : f32 to vector<8x1xf32>
    %158 = arith.select %154, %157, %147 : vector<8x1xi1>, vector<8x1xf32>
    %c7_i32_66 = arith.constant 7 : i32
    %159 = vector.broadcast %c7_i32_66 : i32 to vector<8x1xi32>
    %160 = arith.cmpi eq, %73, %159 : vector<8x1xi32>
    %c7_67 = arith.constant 7 : index
    %161 = memref.load %arg3[%c7_67] : memref<8xi32, #tpu.memory_space<smem>>
    %162 = vector.broadcast %161 : i32 to vector<8x1xi32>
    %163 = arith.select %160, %162, %152 : vector<8x1xi1>, vector<8x1xi32>
    %164 = arith.truncf %72 : vector<8x128xf32> to vector<8x128xbf16>
    %c0_68 = arith.constant 0 : index
    %c0_69 = arith.constant 0 : index
    %165 = vector.load %arg8[%c0_68, %c0_69] : memref<128x128xf32, #tpu.memory_space<vmem>>, vector<128x128xf32>
    %166 = arith.truncf %165 : vector<128x128xf32> to vector<128x128xbf16>
    %cst_70 = arith.constant dense<0.000000e+00> : vector<8x128xf32>
    %167 = tpu.matmul %164, %166, %cst_70 {dimension_numbers = #tpu.dot_dimension_numbers<[1], [0], [0], [1], [0, 0, 1, 1], [], []>} : vector<8x128xbf16>, vector<128x128xbf16>, vector<8x128xf32> -> vector<8x128xf32>
    %c0_71 = arith.constant 0 : index
    %c0_72 = arith.constant 0 : index
    %168 = vector.load %arg9[%c0_71, %c0_72] : memref<1x128xf32, #tpu.memory_space<vmem>>, vector<1x128xf32>
    %169 = vector.broadcast %168 : vector<1x128xf32> to vector<8x128xf32>
    %170 = arith.addf %167, %169 : vector<8x128xf32>
    %cst_73 = arith.constant 5.000000e-01 : f32
    %171 = vector.broadcast %cst_73 : f32 to vector<8x128xf32>
    %172 = arith.mulf %170, %171 : vector<8x128xf32>
    %cst_74 = arith.constant 0.707106769 : f32
    %173 = vector.broadcast %cst_74 : f32 to vector<8x128xf32>
    %174 = arith.mulf %170, %173 : vector<8x128xf32>
    %cst_75 = arith.constant 0.000000e+00 : f32
    %175 = vector.broadcast %cst_75 : f32 to vector<8x128xf32>
    %176 = arith.cmpf oge, %174, %175 : vector<8x128xf32>
    %cst_76 = arith.constant 1.000000e+00 : f32
    %cst_77 = arith.constant -1.000000e+00 : f32
    %177 = vector.broadcast %cst_76 : f32 to vector<8x128xf32>
    %178 = vector.broadcast %cst_77 : f32 to vector<8x128xf32>
    %179 = arith.select %176, %177, %178 : vector<8x128xi1>, vector<8x128xf32>
    %180 = math.absf %174 : vector<8x128xf32>
    %cst_78 = arith.constant 0.327591091 : f32
    %181 = vector.broadcast %cst_78 : f32 to vector<8x128xf32>
    %182 = arith.mulf %181, %180 : vector<8x128xf32>
    %cst_79 = arith.constant 1.000000e+00 : f32
    %183 = vector.broadcast %cst_79 : f32 to vector<8x128xf32>
    %184 = arith.addf %183, %182 : vector<8x128xf32>
    %cst_80 = arith.constant 1.000000e+00 : f32
    %185 = vector.broadcast %cst_80 : f32 to vector<8x128xf32>
    %186 = arith.divf %185, %184 : vector<8x128xf32>
    %cst_81 = arith.constant 1.06140542 : f32
    %187 = vector.broadcast %cst_81 : f32 to vector<8x128xf32>
    %188 = arith.mulf %187, %186 : vector<8x128xf32>
    %cst_82 = arith.constant -1.45315206 : f32
    %189 = vector.broadcast %cst_82 : f32 to vector<8x128xf32>
    %190 = arith.addf %188, %189 : vector<8x128xf32>
    %191 = arith.mulf %190, %186 : vector<8x128xf32>
    %cst_83 = arith.constant 1.42141378 : f32
    %192 = vector.broadcast %cst_83 : f32 to vector<8x128xf32>
    %193 = arith.addf %191, %192 : vector<8x128xf32>
    %194 = arith.mulf %193, %186 : vector<8x128xf32>
    %cst_84 = arith.constant -0.284496725 : f32
    %195 = vector.broadcast %cst_84 : f32 to vector<8x128xf32>
    %196 = arith.addf %194, %195 : vector<8x128xf32>
    %197 = arith.mulf %196, %186 : vector<8x128xf32>
    %cst_85 = arith.constant 0.254829586 : f32
    %198 = vector.broadcast %cst_85 : f32 to vector<8x128xf32>
    %199 = arith.addf %197, %198 : vector<8x128xf32>
    %200 = arith.mulf %199, %186 : vector<8x128xf32>
    %cst_86 = arith.constant 0.000000e+00 : f32
    %201 = vector.broadcast %cst_86 : f32 to vector<8x128xf32>
    %202 = arith.subf %201, %180 : vector<8x128xf32>
    %203 = arith.mulf %202, %180 : vector<8x128xf32>
    %204 = math.exp %203 : vector<8x128xf32>
    %205 = arith.mulf %200, %204 : vector<8x128xf32>
    %cst_87 = arith.constant 1.000000e+00 : f32
    %206 = vector.broadcast %cst_87 : f32 to vector<8x128xf32>
    %207 = arith.subf %206, %205 : vector<8x128xf32>
    %208 = arith.mulf %179, %207 : vector<8x128xf32>
    %cst_88 = arith.constant 1.000000e+00 : f32
    %209 = vector.broadcast %cst_88 : f32 to vector<8x128xf32>
    %210 = arith.addf %209, %208 : vector<8x128xf32>
    %211 = arith.mulf %172, %210 : vector<8x128xf32>
    %cst_89 = arith.constant dense<0.000000e+00> : vector<8xf32>
    %212 = vector.multi_reduction <add>, %211, %cst_89 [1] : vector<8x128xf32> to vector<8xf32>
    %213 = vector.shape_cast %212 : vector<8xf32> to vector<8x1xf32>
    %cst_90 = arith.constant 1.280000e+02 : f32
    %214 = vector.broadcast %cst_90 : f32 to vector<8x1xf32>
    %215 = arith.divf %213, %214 : vector<8x1xf32>
    %216 = vector.broadcast %215 : vector<8x1xf32> to vector<8x128xf32>
    %217 = arith.subf %211, %216 : vector<8x128xf32>
    %218 = arith.mulf %217, %217 : vector<8x128xf32>
    %cst_91 = arith.constant dense<0.000000e+00> : vector<8xf32>
    %219 = vector.multi_reduction <add>, %218, %cst_91 [1] : vector<8x128xf32> to vector<8xf32>
    %220 = vector.shape_cast %219 : vector<8xf32> to vector<8x1xf32>
    %cst_92 = arith.constant 1.280000e+02 : f32
    %221 = vector.broadcast %cst_92 : f32 to vector<8x1xf32>
    %222 = arith.divf %220, %221 : vector<8x1xf32>
    %223 = vector.broadcast %215 : vector<8x1xf32> to vector<8x128xf32>
    %224 = arith.subf %211, %223 : vector<8x128xf32>
    %cst_93 = arith.constant 1.000000e-07 : f32
    %225 = vector.broadcast %cst_93 : f32 to vector<8x1xf32>
    %226 = arith.addf %222, %225 : vector<8x1xf32>
    %227 = math.rsqrt %226 : vector<8x1xf32>
    %228 = vector.broadcast %227 : vector<8x1xf32> to vector<8x128xf32>
    %229 = arith.mulf %224, %228 : vector<8x128xf32>
    %c0_94 = arith.constant 0 : index
    %c0_95 = arith.constant 0 : index
    %230 = vector.load %arg10[%c0_94, %c0_95] : memref<1x128xf32, #tpu.memory_space<vmem>>, vector<1x128xf32>
    %231 = vector.broadcast %230 : vector<1x128xf32> to vector<8x128xf32>
    %232 = arith.mulf %229, %231 : vector<8x128xf32>
    %c0_96 = arith.constant 0 : index
    %c0_97 = arith.constant 0 : index
    %233 = vector.load %arg11[%c0_96, %c0_97] : memref<1x128xf32, #tpu.memory_space<vmem>>, vector<1x128xf32>
    %234 = vector.broadcast %233 : vector<1x128xf32> to vector<8x128xf32>
    %235 = arith.addf %232, %234 : vector<8x128xf32>
    %236 = arith.truncf %235 : vector<8x128xf32> to vector<8x128xbf16>
    %c0_98 = arith.constant 0 : index
    %c0_99 = arith.constant 0 : index
    %237 = vector.load %arg12[%c0_98, %c0_99] : memref<128x256xf32, #tpu.memory_space<vmem>>, vector<128x256xf32>
    %238 = arith.truncf %237 : vector<128x256xf32> to vector<128x256xbf16>
    %cst_100 = arith.constant dense<0.000000e+00> : vector<8x256xf32>
    %239 = tpu.matmul %236, %238, %cst_100 {dimension_numbers = #tpu.dot_dimension_numbers<[1], [0], [0], [1], [0, 0, 1, 1], [], []>} : vector<8x128xbf16>, vector<128x256xbf16>, vector<8x256xf32> -> vector<8x256xf32>
    %c0_101 = arith.constant 0 : index
    %c0_102 = arith.constant 0 : index
    %240 = vector.load %arg13[%c0_101, %c0_102] : memref<1x256xf32, #tpu.memory_space<vmem>>, vector<1x256xf32>
    %241 = vector.broadcast %240 : vector<1x256xf32> to vector<8x256xf32>
    %242 = arith.addf %239, %241 : vector<8x256xf32>
    %243 = tpu.iota {dimensions = array<i32: 1>} : vector<8x256xi32>
    %c2_i32_103 = arith.constant 2 : i32
    %244 = vector.broadcast %c2_i32_103 : i32 to vector<8x256xi32>
    %245 = arith.cmpi slt, %243, %244 : vector<8x256xi32>
    %c10_i32 = arith.constant 10 : i32
    %246 = vector.broadcast %c10_i32 : i32 to vector<8x256xi32>
    %247 = arith.cmpi slt, %243, %246 : vector<8x256xi32>
    %cst_104 = arith.constant 0.000000e+00 : f32
    %248 = vector.broadcast %cst_104 : f32 to vector<8x1xf32>
    %249 = arith.subf %248, %158 : vector<8x1xf32>
    %250 = vector.shape_cast %249 : vector<8x1xf32> to vector<8x1xf32>
    %251 = vector.broadcast %250 : vector<8x1xf32> to vector<8x256xf32>
    %252 = vector.shape_cast %158 : vector<8x1xf32> to vector<8x1xf32>
    %253 = vector.broadcast %252 : vector<8x1xf32> to vector<8x256xf32>
    %254 = arith.select %247, %251, %253 : vector<8x256xi1>, vector<8x256xf32>
    %cst_105 = arith.constant -1.000000e+00 : f32
    %255 = vector.broadcast %cst_105 : f32 to vector<8x256xf32>
    %256 = arith.select %245, %255, %254 : vector<8x256xi1>, vector<8x256xf32>
    %cst_106 = arith.constant 0.000000e+00 : f32
    %257 = vector.broadcast %cst_106 : f32 to vector<8x256xf32>
    %258 = arith.maximumf %256, %257 : vector<8x256xf32>
    %cst_107 = arith.constant 1.000000e+00 : f32
    %259 = vector.broadcast %cst_107 : f32 to vector<8x256xf32>
    %260 = arith.subf %258, %259 : vector<8x256xf32>
    %cst_108 = arith.constant 1.000000e+06 : f32
    %261 = vector.broadcast %cst_108 : f32 to vector<8x256xf32>
    %262 = arith.mulf %261, %260 : vector<8x256xf32>
    %263 = arith.addf %242, %262 : vector<8x256xf32>
    %c0_109 = arith.constant 0 : index
    %c0_110 = arith.constant 0 : index
    %264 = vector.load %arg14[%c0_109, %c0_110] : memref<8x256xf32, #tpu.memory_space<vmem>>, vector<8x256xf32>
    tpu.vector_store %arg14[%c0_109, %c0_110], %263 {strides = array<i32>} : memref<8x256xf32, #tpu.memory_space<vmem>>, vector<8x256xf32>,
    %265 = vector.broadcast %163 : vector<8x1xi32> to vector<8x256xi32>
    %266 = arith.cmpi eq, %243, %265 : vector<8x256xi32>
    %267 = arith.extui %266 : vector<8x256xi1> to vector<8x256xi32>
    %268 = arith.sitofp %267 : vector<8x256xi32> to vector<8x256xf32>
    %269 = arith.subf %258, %268 : vector<8x256xf32>
    %cst_111 = arith.constant dense<0.000000e+00> : vector<8xf32>
    %270 = vector.multi_reduction <add>, %269, %cst_111 [1] : vector<8x256xf32> to vector<8xf32>
    %271 = vector.shape_cast %270 : vector<8xf32> to vector<8x1xf32>
    %cst_112 = arith.constant 1.000000e+00 : f32
    %272 = vector.broadcast %cst_112 : f32 to vector<8x1xf32>
    %273 = arith.addf %272, %158 : vector<8x1xf32>
    %cst_113 = arith.constant 8.000000e-01 : f32
    %274 = vector.broadcast %cst_113 : f32 to vector<8x1xf32>
    %275 = arith.mulf %273, %274 : vector<8x1xf32>
    %cst_114 = arith.constant 1.000000e+00 : f32
    %276 = vector.broadcast %cst_114 : f32 to vector<8x1xf32>
    %277 = arith.subf %276, %158 : vector<8x1xf32>
    %cst_115 = arith.constant 1.000000e+00 : f32
    %278 = vector.broadcast %cst_115 : f32 to vector<8x1xf32>
    %279 = arith.mulf %277, %278 : vector<8x1xf32>
    %280 = arith.addf %275, %279 : vector<8x1xf32>
    %cst_116 = arith.constant 5.000000e-01 : f32
    %281 = vector.broadcast %cst_116 : f32 to vector<8x1xf32>
    %282 = arith.mulf %280, %281 : vector<8x1xf32>
    %283 = vector.broadcast %282 : vector<8x1xf32> to vector<8x256xf32>
    %284 = arith.mulf %283, %268 : vector<8x256xf32>
    %cst_117 = arith.constant 1.000000e+00 : f32
    %285 = vector.broadcast %cst_117 : f32 to vector<8x1xf32>
    %286 = arith.subf %285, %282 : vector<8x1xf32>
    %287 = vector.broadcast %286 : vector<8x1xf32> to vector<8x256xf32>
    %288 = arith.mulf %287, %269 : vector<8x256xf32>
    %cst_118 = arith.constant 1.000000e+00 : f32
    %289 = vector.broadcast %cst_118 : f32 to vector<8x1xf32>
    %290 = arith.divf %289, %271 : vector<8x1xf32>
    %291 = vector.broadcast %290 : vector<8x1xf32> to vector<8x256xf32>
    %292 = arith.mulf %288, %291 : vector<8x256xf32>
    %293 = arith.addf %284, %292 : vector<8x256xf32>
    %cst_119 = arith.constant dense<0xFF800000> : vector<8xf32>
    %294 = vector.multi_reduction <maximumf>, %263, %cst_119 [1] : vector<8x256xf32> to vector<8xf32>
    %295 = vector.shape_cast %294 : vector<8xf32> to vector<8x1xf32>
    %296 = vector.broadcast %295 : vector<8x1xf32> to vector<8x256xf32>
    %297 = arith.subf %263, %296 : vector<8x256xf32>
    %298 = math.exp %297 : vector<8x256xf32>
    %cst_120 = arith.constant dense<0.000000e+00> : vector<8xf32>
    %299 = vector.multi_reduction <add>, %298, %cst_120 [1] : vector<8x256xf32> to vector<8xf32>
    %300 = vector.shape_cast %299 : vector<8xf32> to vector<8x1xf32>
    %301 = math.log %300 : vector<8x1xf32>
    %302 = arith.addf %295, %301 : vector<8x1xf32>
    %303 = vector.broadcast %302 : vector<8x1xf32> to vector<8x256xf32>
    %304 = arith.subf %263, %303 : vector<8x256xf32>
    %305 = arith.mulf %293, %304 : vector<8x256xf32>
    %cst_121 = arith.constant dense<0.000000e+00> : vector<8xf32>
    %306 = vector.multi_reduction <add>, %305, %cst_121 [1] : vector<8x256xf32> to vector<8xf32>
    %307 = vector.shape_cast %306 : vector<8xf32> to vector<8x1xf32>
    %cst_122 = arith.constant 0.000000e+00 : f32
    %308 = vector.broadcast %cst_122 : f32 to vector<8x1xf32>
    %309 = arith.subf %308, %307 : vector<8x1xf32>
    %310 = vector.shape_cast %309 : vector<8x1xf32> to vector<1x8x1xf32>
    %cst_123 = arith.constant dense<0.000000e+00> : vector<1xf32>
    %311 = vector.multi_reduction <add>, %310, %cst_123 [1, 2] : vector<1x8x1xf32> to vector<1xf32>
    %312 = vector.shape_cast %311 : vector<1xf32> to vector<1x1x1xf32>
    %313 = vector.extract %312[0, 0, 0] : f32 from vector<1x1x1xf32>
    %cst_124 = arith.constant 1.250000e-01 : f32
    %314 = arith.mulf %313, %cst_124 : f32
    %c0_125 = arith.constant 0 : index
    %c0_126 = arith.constant 0 : index
    %315 = memref.load %arg15[%c0_125, %c0_126] : memref<1x1xf32, #tpu.memory_space<smem>>
    memref.store %314, %arg15[%c0_125, %c0_126] : memref<1x1xf32, #tpu.memory_space<smem>>
    return
  }
  func.func @transform_0(%arg0: i32, %arg1: memref<8x8xi32, #tpu.memory_space<smem>>, %arg2: memref<8xi32, #tpu.memory_space<smem>>, %arg3: memref<8xi32, #tpu.memory_space<smem>>, %arg4: memref<8xi32, #tpu.memory_space<smem>>) -> (i32, i32) {
    %c0_i32 = arith.constant 0 : i32
    %c0_i32_0 = arith.constant 0 : i32
    %c0_i32_1 = arith.constant 0 : i32
    return %c0_i32, %c0_i32_0 : i32, i32
  }
  func.func @transform_1(%arg0: i32, %arg1: memref<8x8xi32, #tpu.memory_space<smem>>, %arg2: memref<8xi32, #tpu.memory_space<smem>>, %arg3: memref<8xi32, #tpu.memory_space<smem>>, %arg4: memref<8xi32, #tpu.memory_space<smem>>) -> (i32, i32) {
    %c0_i32 = arith.constant 0 : i32
    %c0_i32_0 = arith.constant 0 : i32
    %c0_i32_1 = arith.constant 0 : i32
    return %c0_i32, %c0_i32_0 : i32, i32
  }
  func.func @transform_2(%arg0: i32, %arg1: memref<8x8xi32, #tpu.memory_space<smem>>, %arg2: memref<8xi32, #tpu.memory_space<smem>>, %arg3: memref<8xi32, #tpu.memory_space<smem>>, %arg4: memref<8xi32, #tpu.memory_space<smem>>) -> (i32, i32) {
    %c0_i32 = arith.constant 0 : i32
    %c0_i32_0 = arith.constant 0 : i32
    %c0_i32_1 = arith.constant 0 : i32
    return %c0_i32, %c0_i32_0 : i32, i32
  }
  func.func @transform_3(%arg0: i32, %arg1: memref<8x8xi32, #tpu.memory_space<smem>>, %arg2: memref<8xi32, #tpu.memory_space<smem>>, %arg3: memref<8xi32, #tpu.memory_space<smem>>, %arg4: memref<8xi32, #tpu.memory_space<smem>>) -> (i32, i32) {
    %c0_i32 = arith.constant 0 : i32
    %c0_i32_0 = arith.constant 0 : i32
    %c0_i32_1 = arith.constant 0 : i32
    return %c0_i32, %c0_i32_0 : i32, i32
  }
  func.func @transform_4(%arg0: i32, %arg1: memref<8x8xi32, #tpu.memory_space<smem>>, %arg2: memref<8xi32, #tpu.memory_space<smem>>, %arg3: memref<8xi32, #tpu.memory_space<smem>>, %arg4: memref<8xi32, #tpu.memory_space<smem>>) -> (i32, i32) {
    %c0_i32 = arith.constant 0 : i32
    %c0_i32_0 = arith.constant 0 : i32
    %c0_i32_1 = arith.constant 0 : i32
    return %c0_i32, %c0_i32_0 : i32, i32
  }
  func.func @transform_5(%arg0: i32, %arg1: memref<8x8xi32, #tpu.memory_space<smem>>, %arg2: memref<8xi32, #tpu.memory_space<smem>>, %arg3: memref<8xi32, #tpu.memory_space<smem>>, %arg4: memref<8xi32, #tpu.memory_space<smem>>) -> (i32, i32) {
    %c0_i32 = arith.constant 0 : i32
    %c0_i32_0 = arith.constant 0 : i32
    %c0_i32_1 = arith.constant 0 : i32
    return %c0_i32, %c0_i32_0 : i32, i32
  }
  func.func @transform_6(%arg0: i32, %arg1: memref<8x8xi32, #tpu.memory_space<smem>>, %arg2: memref<8xi32, #tpu.memory_space<smem>>, %arg3: memref<8xi32, #tpu.memory_space<smem>>, %arg4: memref<8xi32, #tpu.memory_space<smem>>) -> (i32, i32) {
    %c0_i32 = arith.constant 0 : i32
    %c0_i32_0 = arith.constant 0 : i32
    %c0_i32_1 = arith.constant 0 : i32
    return %c0_i32, %c0_i32_0 : i32, i32
  }
  func.func @transform_7(%arg0: i32, %arg1: memref<8x8xi32, #tpu.memory_space<smem>>, %arg2: memref<8xi32, #tpu.memory_space<smem>>, %arg3: memref<8xi32, #tpu.memory_space<smem>>, %arg4: memref<8xi32, #tpu.memory_space<smem>>) -> (i32, i32) {
    %c0_i32 = arith.constant 0 : i32
    %c0_i32_0 = arith.constant 0 : i32
    %c0_i32_1 = arith.constant 0 : i32
    return %c0_i32, %c0_i32_0 : i32, i32
  }
  func.func @transform_8(%arg0: i32, %arg1: memref<8x8xi32, #tpu.memory_space<smem>>, %arg2: memref<8xi32, #tpu.memory_space<smem>>, %arg3: memref<8xi32, #tpu.memory_space<smem>>, %arg4: memref<8xi32, #tpu.memory_space<smem>>) -> (i32, i32) {
    %c0_i32 = arith.constant 0 : i32
    %c0_i32_0 = arith.constant 0 : i32
    %c0_i32_1 = arith.constant 0 : i32
    return %c0_i32, %c0_i32_0 : i32, i32
  }
  func.func @transform_9(%arg0: i32, %arg1: memref<8x8xi32, #tpu.memory_space<smem>>, %arg2: memref<8xi32, #tpu.memory_space<smem>>, %arg3: memref<8xi32, #tpu.memory_space<smem>>, %arg4: memref<8xi32, #tpu.memory_space<smem>>) -> (i32, i32) {
    %c0_i32 = arith.constant 0 : i32
    %c0_i32_0 = arith.constant 0 : i32
    %c0_i32_1 = arith.constant 0 : i32
    return %c0_i32, %c0_i32_0 : i32, i32
  }
  func.func @transform_10(%arg0: i32, %arg1: memref<8x8xi32, #tpu.memory_space<smem>>, %arg2: memref<8xi32, #tpu.memory_space<smem>>, %arg3: memref<8xi32, #tpu.memory_space<smem>>, %arg4: memref<8xi32, #tpu.memory_space<smem>>) -> (i32, i32) {
    %c0_i32 = arith.constant 0 : i32
    %c0_i32_0 = arith.constant 0 : i32
    %c0_i32_1 = arith.constant 0 : i32
    return %c0_i32, %c0_i32_0 : i32, i32
  }
}

</mosaic_0001>

<bundles_post_ra>
// kernel: hypergraph_forward.1
= control target key start
LH: loop header
LB: loop body
LE: loop exit
PB: predicated region body
PF: predicated region fallthrough
CT: control target
= control target key end

     0   :  { %s1049_s19 = smov [#allocation4]   ;;  %s1050_s20 = smov [#allocation5]   ;;  %s1250_s0 = inlined_call_operand.hbm [shape: s32[8,8], index: 0, kind: input, shape index: {}]   ;;  %s1251_s4 = inlined_call_operand.hbm [shape: f32[256,128], index: 4, kind: input, shape index: {}]   ;;  %s1252_s5 = inlined_call_operand.hbm [shape: f32[1,128], index: 5, kind: input, shape index: {}]   ;;  %s1253_s6 = inlined_call_operand.hbm [shape: f32[1,128], index: 6, kind: input, shape index: {}]   ;;  %s1254_s7 = inlined_call_operand.hbm [shape: f32[128,128], index: 7, kind: input, shape index: {}]   ;;  %s1255_s8 = inlined_call_operand.hbm [shape: f32[1,128], index: 8, kind: input, shape index: {}]   ;;  %s1256_s9 = inlined_call_operand.vmem [shape: f32[1,128], index: 9, kind: input, shape index: {}]   ;;  %s1257_s10 = inlined_call_operand.hbm [shape: f32[1,128], index: 10, kind: input, shape index: {}]   ;;  %s1258_s11 = inlined_call_operand.hbm [shape: f32[128,256], index: 11, kind: input, shape index: {}]   ;;  %s1259_s12 = inlined_call_operand.vmem [shape: f32[1,256], index: 12, kind: input, shape index: {}]   ;;  %s1260_s13 = inlined_call_operand.hbm [shape: f32[8,256], index: 13, kind: output, shape index: {0}]   ;;  %s1261_s14 = inlined_call_operand.hbm [shape: f32[1,1], index: 14, kind: output, shape index: {1}]   ;;  %s1262_s1 = inlined_call_operand.vmem [shape: s32[8], index: 1, kind: input, shape index: {}]   ;;  %s1263_s2 = inlined_call_operand.vmem [shape: s32[8], index: 2, kind: input, shape index: {}]   ;;  %s1264_s3 = inlined_call_operand.vmem [shape: s32[8], index: 3, kind: input, shape index: {}]  }
   0x1   :  { %s21_s15 = sshll.u32 %s1250_s0, 4  ;;  %s26_s18 = sshll.u32 %s1262_s1, 4  ;;  %s22_s15 = int_to_ptr.hbm [resolvable:$true] %s21_s15  ;;  %s27_s18 = int_to_ptr.vmem [resolvable:$true] %s26_s18 }
   0x2   :  { %24 = dma.hbm_to_smem %s22_s15, 128, %s1049_s19, [#allocation3] }
   0x3   :  { %29 = dma.vmem_to_smem %s27_s18, 16, %s1050_s20, [#allocation3] }
   0x4   :  { %s31_s23 = sshll.u32 %s1263_s2, 4  ;;  %s36_s26 = sshll.u32 %s1264_s3, 4  ;;  %s32_s23 = int_to_ptr.vmem [resolvable:$true] %s31_s23  ;;  %s37_s26 = int_to_ptr.vmem [resolvable:$true] %s36_s26 }
   0x5   :  { %s1051_s0 = smov [#allocation6]   ;;  %s1052_s27 = smov [#allocation7]  }
   0x6   :  { %34 = dma.vmem_to_smem %s32_s23, 16, %s1051_s0, [#allocation3] }
   0x7   :  { %39 = dma.vmem_to_smem %s37_s26, 16, %s1052_s27, [#allocation3] }
   0x8   :  { %1035 = dma.done.wait [#allocation3], 176 }
   0x9   :  { %1036 = vsyncadd [#allocation3], 4294967120 }
   0xa   :  { %42 = sfence }
   0xb   :  { %43 = vsyncpa [#allocation9], 0 }
   0xc   :  { %44 = vsyncpa [#allocation13], 0 }
   0xd   :  { %45 = vsyncpa [#allocation16], 0 }
   0xe   :  { %46 = vsyncpa [#allocation19], 0 }
   0xf   :  { %47 = vsyncpa [#allocation10], 0  ;;  %s67_s28 = sshll.u32 %s1252_s5, 4  ;;  %s68_s28 = int_to_ptr.hbm [resolvable:$true] %s67_s28 }
  0x10   :  { %48 = vsyncpa [#allocation11], 0  ;;  %s1053_s3 = smov [#allocation12]   ;;  %s88_s16 = sshll.u32 %s1254_s7, 4  ;;  %s89_s16 = int_to_ptr.hbm [resolvable:$true] %s88_s16 }
  0x11   :  { %s69_s29 = sshll.u32 %s1053_s3, 4  ;;  %s1054_s17 = smov [#allocation15]   ;;  %s70_s29 = int_to_ptr.vmem [resolvable:$true] %s69_s29 }
  0x12   :  { %72 = dma.hbm_to_vmem [thread:$0]  %s68_s28, 16, %s70_s29, [#allocation13]  }
  0x13   :  { %s90_s18 = sshll.u32 %s1054_s17, 4  ;;  %s115_s21 = sshll.u32 %s1257_s10, 4  ;;  %s91_s18 = int_to_ptr.vmem [resolvable:$true] %s90_s18  ;;  %s116_s21 = int_to_ptr.hbm [resolvable:$true] %s115_s21 }
  0x14   :  { %s1055_s5 = smov 128   ;;  %s1056_s22 = smov 8  }
  0x15   :  { %96 = dma.hbm_to_vmem [thread:$0]  %s89_s16, 2048, %s91_s18, [#allocation16], %s1055_s5, %s1055_s5, %s1056_s22  }
  0x16   :  { %s53_s25 = sshll.u32 %s1251_s4, 4  ;;  %s1057_s26 = smov [#allocation18]   ;;  %s54_s25 = int_to_ptr.hbm [resolvable:$true] %s53_s25 }
  0x17   :  { %s117_s0 = sshll.u32 %s1057_s26, 4  ;;  %s1058_s7 = smov [#allocation8]   ;;  %s118_s0 = int_to_ptr.vmem [resolvable:$true] %s117_s0 }
  0x18   :  { %120 = dma.hbm_to_vmem [thread:$0]  %s116_s21, 16, %s118_s0, [#allocation19]  }
  0x19   :  { %s55_s27 = sshll.u32 %s1058_s7, 4  ;;  %s78_s10 = sshll.u32 %s1253_s6, 4  ;;  %s56_s27 = int_to_ptr.vmem [resolvable:$true] %s55_s27  ;;  %s79_s10 = int_to_ptr.hbm [resolvable:$true] %s78_s10 }
  0x1a   :  { %61 = dma.hbm_to_vmem [thread:$0]  %s54_s25, 4096, %s56_s27, [#allocation9], %s1055_s5, %s1055_s5, %s1056_s22  }
  0x1b   :  { %s102_s29 = sshll.u32 %s1255_s8, 4  ;;  %s1059_s30 = smov [#allocation14]   ;;  %s103_s29 = int_to_ptr.hbm [resolvable:$true] %s102_s29 }
  0x1c   :  { %s80_s4 = sshll.u32 %s1059_s30, 4  ;;  %s1060_s15 = smov [#allocation17]   ;;  %s81_s4 = int_to_ptr.vmem [resolvable:$true] %s80_s4 }
  0x1d   :  { %83 = dma.hbm_to_vmem [thread:$0]  %s79_s10, 16, %s81_s4, [#allocation13]  }
  0x1e   :  { %s104_s16 = sshll.u32 %s1060_s15, 4  ;;  %s125_s19 = sshll.u32 %s1258_s11, 4  ;;  %s105_s16 = int_to_ptr.vmem [resolvable:$true] %s104_s16  ;;  %s126_s19 = int_to_ptr.hbm [resolvable:$true] %s125_s19 }
  0x1f   :  { %107 = dma.hbm_to_vmem [thread:$0]  %s103_s29, 16, %s105_s16, [#allocation16]  }
  0x20   :  { %s1061_s6 = smov [#allocation20]   ;;  %s1062_s21 = smov 256  }
  0x21   :  { %s127_s20 = sshll.u32 %s1061_s6, 4  ;;  %s1063_s5 = smov 16   ;;  %s128_s20 = int_to_ptr.vmem [resolvable:$true] %s127_s20 }
  0x22   :  { %133 = dma.hbm_to_vmem [thread:$0]  %s126_s19, 4096, %s128_s20, [#allocation19], %s1062_s21, %s1062_s21, %s1063_s5  }
  0x23   :  { %1037 = dma.done.wait [#allocation9], 4096  }
  0x24   :  { %1038 = vsyncadd [#allocation9], 4294963200 }
  0x25   :  { %1039 = dma.done.wait [#allocation13], 32  }
  0x26   :  { %1040 = vsyncadd [#allocation13], 4294967264 }
  0x27   :  { %1041 = dma.done.wait [#allocation16], 2064  }
  0x28   :  { %1042 = vsyncadd [#allocation16], 4294965232 }
  0x29   :  { %1043 = dma.done.wait [#allocation19], 4112  }
  0x2a   :  { %1044 = vsyncadd [#allocation19], 4294963184  ;;  %s164_s8 = sld [smem:[#allocation5]]  ;;  %v1064_v9 = vmov 128.0   ;;  %v372_v10 = vld [vmem:[#allocation15 + $0x70] sm:$0xff]  ;;  %v373_v11 = vld [vmem:[#allocation15 + $0x78] sm:$0xff] }
  0x2b   :  { %s692_s22 = sld [smem:[#allocation5 + $0x1]]  ;;  %765 = vrcp.f32 %v1064_v9  ;;  %v381_v12 = vpack.c.bf16 %v373_v11, %v372_v10  ;;  %v370_v23 = vld [vmem:[#allocation15 + $0x60] sm:$0xff]  ;;  %v371_v24 = vld [vmem:[#allocation15 + $0x68] sm:$0xff]  ;;  %v368_v26 = vld [vmem:[#allocation15 + $0x50] sm:$0xff] }
  0x2c   :  { %s694_s11 = sld [smem:[#allocation5 + $0x2]]  ;;  %v380_v25 = vpack.c.bf16 %v371_v24, %v370_v23  ;;  %v369_v27 = vld [vmem:[#allocation15 + $0x58] sm:$0xff]  ;;  %v366_v29 = vld [vmem:[#allocation15 + $0x40] sm:$0xff]  ;;  %v367_v30 = vld [vmem:[#allocation15 + $0x48] sm:$0xff] }
  0x2d   :  { %s696_s23 = sld [smem:[#allocation5 + $0x3]]  ;;  %386 = vmatpush.bf16.msra.mxu0 %v381_v12  ;;  %v379_v28 = vpack.c.bf16 %v369_v27, %v368_v26  ;;  %v378_v31 = vpack.c.bf16 %v367_v30, %v366_v29  ;;  %v364_v32 = vld [vmem:[#allocation15 + $0x30] sm:$0xff]  ;;  %v365_v33 = vld [vmem:[#allocation15 + $0x38] sm:$0xff]  ;;  %v362_v35 = vld [vmem:[#allocation15 + $0x20] sm:$0xff]  ;;  %v1065_v30 = vmov -1.0  }
  0x2e   :  { %s1177_s24 = sld [smem:[#allocation5 + $0x4]]  ;;  %v377_v34 = vpack.c.bf16 %v365_v33, %v364_v32  ;;  %v363_v36 = vld [vmem:[#allocation15 + $0x28] sm:$0xff]  ;;  %v360_v38 = vld [vmem:[#allocation15 + $0x10] sm:$0xff]  ;;  %v361_v39 = vld [vmem:[#allocation15 + $0x18] sm:$0xff] }
  0x2f   :  { %s1179_s25 = sld [smem:[#allocation5 + $0x5]]  ;;  %v376_v37 = vpack.c.bf16 %v363_v36, %v362_v35  ;;  %v375_v40 = vpack.c.bf16 %v361_v39, %v360_v38  ;;  %v358_v41 = vld [vmem:[#allocation15] sm:$0xff]  ;;  %v359_v42 = vld [vmem:[#allocation15 + $0x8] sm:$0xff]  ;;  %v760_v53 = vld [vmem:[#allocation12] ss:$0 sm:$0xff] }
  0x30   :  { %s165_s26 = sld [smem:[#allocation4 + %s164_s8]]  ;;  %v374_v43 = vpack.c.bf16 %v359_v42, %v358_v41  ;;  %v761_v56 = vld [vmem:[#allocation14] ss:$0 sm:$0xff]  ;;  %v762_v60 = vld [vmem:[#allocation17] ss:$0 sm:$0xff]  ;;  %v498_v36 = vld [vmem:[#allocation20 + $0xe0] sm:$0xff] }
  0x31   :  { %s170_s0 = sshra.s32 %s692_s22, 7  ;;  %s175_s7 = sand.u32 127, %s692_s22  ;;  %v766_v13 = vpop.eup %765  ;;  %387 = vmatpush.bf16.msra.mxu0 %v380_v25  ;;  %v499_v38 = vld [vmem:[#allocation20 + $0xe8] sm:$0xff] }
  0x32   :  { %s724_s27 = sshll.u32 %s170_s0, 7  ;;  %s182_s1 = sshra.s32 %s694_s11, 7  ;;  %v257_v14 = vmul.f32 128.0, %v766_v13  ;;  %vm261_vm0 = vweird.f32 %v766_v13 }
  0x33   :  { %s725_s2 = sadd.s32 128, %s724_s27  ;;  %s726_s10 = sshll.u32 %s182_s1, 7 }
  0x34   :  { %s176_s28 = sadd.s32 %s725_s2, %s175_s7  ;;  %s727_s3 = sadd.s32 256, %s726_s10  ;;  %v258_v15 = vsub.f32 1.0, %v257_v14 }
  0x35   :  { %s177_s29 = sld [smem:[#allocation4 + %s176_s28]]  ;;  %s187_s30 = sand.u32 127, %s694_s11  ;;  %388 = vmatpush.bf16.msra.mxu0 %v379_v28 }
  0x36   :  { %s188_s4 = sadd.s32 %s727_s3, %s187_s30  ;;  %s166_s15 = scalar_lea.vmem [#allocation8], %s165_s26  ;;  %v259_v16 = vmul.f32 %v766_v13, %v258_v15 }
  0x37   :  { %v167_v0 = vld [vmem:[%s166_s15] sm:$0x1]  ;;  %s189_s16 = sld [smem:[#allocation4 + %s188_s4]]  ;;  %s194_s17 = sshra.s32 %s696_s23, 7 }
  0x38   :  { %168 = vst [vmem:[#allocation2] sm:$0x1] %v167_v0  ;;  %s728_s18 = sshll.u32 %s194_s17, 7  ;;  %s199_s19 = sand.u32 127, %s696_s23  ;;  %v260_v17 = vadd.f32 %v766_v13, %v259_v16 }
  0x39   :  { %s729_s6 = sadd.s32 384, %s728_s18  ;;  %s206_s20 = sshra.s32 %s1177_s24, 7  ;;  %389 = vmatpush.bf16.msra.mxu0 %v378_v31 }
  0x3a   :  { %s200_s21 = sadd.s32 %s729_s6, %s199_s19  ;;  %s730_s5 = sshll.u32 %s206_s20, 7  ;;  %v1185_v18 = vsel %vm261_vm0, %v766_v13, %v260_v17 }
  0x3b   :  { %s201_s8 = sld [smem:[#allocation4 + %s200_s21]]  ;;  %s178_s22 = scalar_lea.vmem [#allocation8], %s177_s29 }
  0x3c   :  { %v179_v1 = vld [vmem:[%s178_s22] sm:$0x1]  ;;  %s731_s0 = sadd.s32 512, %s730_s5  ;;  %s211_s11 = sand.u32 127, %s1177_s24 }
  0x3d   :  { %180 = vst [vmem:[#allocation2 + $0x1] sm:$0x1] %v179_v1  ;;  %s212_s7 = sadd.s32 %s731_s0, %s211_s11  ;;  %s190_s26 = scalar_lea.vmem [#allocation8], %s189_s16  ;;  %390 = vmatpush.bf16.msra.mxu0 %v377_v34 }
  0x3e   :  { %v191_v2 = vld [vmem:[%s190_s26] sm:$0x1]  ;;  %s213_s27 = sld [smem:[#allocation4 + %s212_s7]]  ;;  %s218_s1 = sshra.s32 %s1179_s25, 7 }
  0x3f   :  { %192 = vst [vmem:[#allocation2 + $0x2] sm:$0x1] %v191_v2  ;;  %s732_s2 = sshll.u32 %s218_s1, 7  ;;  %s223_s10 = sand.u32 127, %s1179_s25 }
  0x40   :  { %s733_s23 = sadd.s32 640, %s732_s2  ;;  %s702_s28 = sld [smem:[#allocation5 + $0x6]] }
  0x41   :  { %s224_s3 = sadd.s32 %s733_s23, %s223_s10  ;;  %s202_s30 = scalar_lea.vmem [#allocation8], %s201_s8  ;;  %391 = vmatpush.bf16.msra.mxu0 %v376_v37  ;;  %v500_v37 = vld [vmem:[#allocation20 + $0xf0] sm:$0xff] }
  0x42   :  { %v203_v3 = vld [vmem:[%s202_s30] sm:$0x1]  ;;  %s225_s4 = sld [smem:[#allocation4 + %s224_s3]]  ;;  %v516_v39 = vpack.c.bf16 %v500_v37, %v498_v36  ;;  %v764_v37 = vld [vmem:[#allocation18] ss:$0 sm:$0xff] }
  0x43   :  { %204 = vst [vmem:[#allocation2 + $0x3] sm:$0x1] %v203_v3  ;;  %s704_s29 = sld [smem:[#allocation5 + $0x7]] }
  0x44   :  { %s214_s15 = scalar_lea.vmem [#allocation8], %s213_s27  ;;  %524 = vmatpush.bf16.msra.mxu1 %v516_v39  ;;  %s294_s1 = sld [smem:[#allocation7]] }
  0x45   :  { %v215_v4 = vld [vmem:[%s214_s15] sm:$0x1]  ;;  %392 = vmatpush.bf16.msra.mxu0 %v375_v40  ;;  %v501_v40 = vld [vmem:[#allocation20 + $0xf8] sm:$0xff]  ;;  %s706_s2 = sld [smem:[#allocation7 + $0x1]] }
  0x46   :  { %216 = vst [vmem:[#allocation2 + $0x4] sm:$0x1] %v215_v4  ;;  %s230_s24 = sshra.s32 %s702_s28, 7  ;;  %s235_s17 = sand.u32 127, %s702_s28  ;;  %v517_v41 = vpack.c.bf16 %v501_v40, %v499_v38  ;;  %v291_v40 = vlaneseq }
  0x47   :  { %s734_s16 = sshll.u32 %s230_s24, 7  ;;  %s708_s10 = sld [smem:[#allocation7 + $0x2]] }
  0x48   :  { %s735_s18 = sadd.s32 768, %s734_s16  ;;  %s226_s19 = scalar_lea.vmem [#allocation8], %s225_s4  ;;  %537 = vmatpush.bf16.msra.mxu2 %v517_v41  ;;  %v1199_v41 = vshrl.u32 %v291_v40, 7 }
  0x49   :  { %v227_v5 = vld [vmem:[%s226_s19] sm:$0x1]  ;;  %s236_s6 = sadd.s32 %s735_s18, %s235_s17  ;;  %s242_s20 = sshra.s32 %s704_s29, 7  ;;  %393 = vmatpush.bf16.msra.mxu0 %v374_v43 }
  0x4a   :  { %228 = vst [vmem:[#allocation2 + $0x5] sm:$0x1] %v227_v5  ;;  %s237_s25 = sld [smem:[#allocation4 + %s236_s6]]  ;;  %s736_s21 = sshll.u32 %s242_s20, 7  ;;  %vm293_vm12 = vcmp.eq.s32.totalorder %v1199_v41, 0  ;;  %vm301_vm13 = vcmp.eq.s32.totalorder %v1199_v41, 1 }
  0x4b   :  { %s737_s5 = sadd.s32 896, %s736_s21  ;;  %s247_s8 = sand.u32 127, %s704_s29  ;;  %vm309_vm14 = vcmp.eq.s32.totalorder %v1199_v41, 2  ;;  %vm317_vm15 = vcmp.eq.s32.totalorder %v1199_v41, 3  ;;  %vm325_vm0 = vcmp.eq.s32.totalorder %v1199_v41, 4 }
  0x4c   :  { %s248_s22 = sadd.s32 %s737_s5, %s247_s8  ;;  %s295_s23 = scvt.s32.f32 %s294_s1 }
  0x4d   :  { %s249_s0 = sld [smem:[#allocation4 + %s248_s22]]  ;;  %s303_s3 = scvt.s32.f32 %s706_s2 }
  0x4e   :  { %s710_s28 = sld [smem:[#allocation7 + $0x3]]  ;;  %s311_s30 = scvt.s32.f32 %s708_s10 }
  0x4f   :  { %s714_s4 = sld [smem:[#allocation7 + $0x5]]  ;;  %s656_s2 = sshll.u32 %s1260_s13, 4  ;;  %s657_s2 = int_to_ptr.hbm [resolvable:$true] %s656_s2 }
  0x50   :  { %s238_s11 = scalar_lea.vmem [#allocation8], %s237_s25  ;;  %s716_s15 = sld [smem:[#allocation7 + $0x6]] }
  0x51   :  { %v239_v6 = vld [vmem:[%s238_s11] sm:$0x1]  ;;  %s718_s17 = sld [smem:[#allocation7 + $0x7]]  ;;  %s1068_s13 = smov [#allocation22]  }
  0x52   :  { %240 = vst [vmem:[#allocation2 + $0x6] sm:$0x1] %v239_v6  ;;  %s298_s6 = sld [smem:[#allocation6]] }
  0x53   :  { %s250_s7 = scalar_lea.vmem [#allocation8], %s249_s0  ;;  %s707_s20 = sld [smem:[#allocation6 + $0x1]] }
  0x54   :  { %v251_v7 = vld [vmem:[%s250_s7] sm:$0x1]  ;;  %s319_s29 = scvt.s32.f32 %s710_s28  ;;  %s709_s25 = sld [smem:[#allocation6 + $0x2]] }
  0x55   :  { %252 = vst [vmem:[#allocation2 + $0x7] sm:$0x1] %v251_v7  ;;  %s335_s16 = scvt.s32.f32 %s714_s4  ;;  %s711_s21 = sld [smem:[#allocation6 + $0x3]] }
  0x56   :  { %s343_s18 = scvt.s32.f32 %s716_s15  ;;  %s713_s5 = sld [smem:[#allocation6 + $0x4]] }
  0x57   :  { %s351_s19 = scvt.s32.f32 %s718_s17  ;;  %s715_s8 = sld [smem:[#allocation6 + $0x5]] }
  0x58   :  { %s717_s22 = sld [smem:[#allocation6 + $0x6]]  ;;  %s665_s28 = sshll.u32 %s1261_s14, 4  ;;  %s666_s28 = int_to_ptr.hbm [resolvable:$true] %s665_s28 }
  0x59   :  { %s719_s0 = sld [smem:[#allocation6 + $0x7]] }
  0x5c   :  { %v253_v8 = vld [vmem:[#allocation2] sm:$0xff] }
  0x5d   :  { %254 = vadd.xlane.f32.xlu0 %v253_v8 }
  0xd0   :  { %v255_v19 = vpop.xlane.xlu0 %254 }
  0xd1   :  { %v263_v20 = vmul.f32 %v1185_v18, %v255_v19 }
  0xd3   :  { %v264_v21 = vsub.f32 %v253_v8, %v263_v20 }
  0xd5   :  { %v265_v22 = vmul.f32 %v264_v21, %v264_v21 }
  0xd7   :  { %266 = vadd.xlane.f32.xlu0 %v265_v22 }
 0x14a   :  { %v267_v44 = vpop.xlane.xlu0 %266 }
 0x14b   :  { %v268_v45 = vmul.f32 %v267_v44, %v1185_v18 }
 0x14d   :  { %v269_v46 = vadd.f32 1e-12, %v268_v45 }
 0x14f   :  { %767 = vrsqrt.f32 %v269_v46  ;;  %vm276_vm2 = vweird.f32 %v269_v46 }
 0x155   :  { %v768_v47 = vpop.eup %767 }
 0x156   :  { %v271_v48 = vmul.f32 %v768_v47, %v269_v46  ;;  %vm277_vm1 = vweird.f32 %v768_v47  ;;  %v494_v46 = vld [vmem:[#allocation20 + $0xc0] sm:$0xff] }
 0x157   :  { %vm278_vm3 = vmor %vm276_vm2, %vm277_vm1  ;;  %vm333_vm1 = vcmp.eq.s32.totalorder %v1199_v41, 5  ;;  %vm341_vm2 = vcmp.eq.s32.totalorder %v1199_v41, 6 }
 0x158   :  { %v272_v49 = vmul.f32 %v768_v47, %v271_v48  ;;  %v495_v48 = vld [vmem:[#allocation20 + $0xc8] sm:$0xff] }
 0x15a   :  { %v273_v50 = vmul.f32 0.5, %v272_v49 }
 0x15c   :  { %v274_v51 = vsub.f32 1.5, %v273_v50  ;;  %v497_v50 = vld [vmem:[#allocation20 + $0xd8] sm:$0xff] }
 0x15e   :  { %v275_v52 = vmul.f32 %v768_v47, %v274_v51  ;;  %v515_v51 = vpack.c.bf16 %v497_v50, %v495_v48  ;;  %v320_v48 = vstv %s319_s29 }
 0x160   :  { %v279_v54 = vsel %vm278_vm3, %v768_v47, %v275_v52  ;;  %v496_v47 = vld [vmem:[#allocation20 + $0xd0] sm:$0xff]  ;;  %538 = vmatpush.bf16.msra.mxu2 %v515_v51  ;;  %v490_v52 = vld [vmem:[#allocation20 + $0xa0] sm:$0xff]  ;;  %vm349_vm3 = vcmp.eq.s32.totalorder %v1199_v41, 7 }
 0x161   :  { %v280_v55 = vmul.f32 %v279_v54, %v264_v21  ;;  %v514_v49 = vpack.c.bf16 %v496_v47, %v494_v46  ;;  %v491_v54 = vld [vmem:[#allocation20 + $0xa8] sm:$0xff]  ;;  %v312_v46 = vstv %s311_s30 }
 0x163   :  { %v285_v57 = vmul.f32 %v760_v53, %v280_v55  ;;  %525 = vmatpush.bf16.msra.mxu1 %v514_v49  ;;  %v492_v53 = vld [vmem:[#allocation20 + $0xb0] sm:$0xff] }
 0x164   :  { %v512_v55 = vpack.c.bf16 %v492_v53, %v490_v52  ;;  %v336_v52 = vstv %s335_s16 }
 0x165   :  { %v290_v58 = vadd.f32 %v761_v56, %v285_v57  ;;  %v493_v56 = vld [vmem:[#allocation20 + $0xb8] sm:$0xff] }
 0x166   :  { %v513_v57 = vpack.c.bf16 %v493_v56, %v491_v54  ;;  %v344_v54 = vstv %s343_s18  ;;  %v352_v56 = vstv %s351_s19 }
 0x167   :  { %v357_v59 = vpack.c.bf16 %v290_v58, %v290_v58  ;;  %526 = vmatpush.bf16.msra.mxu1 %v512_v55  ;;  %v486_v58 = vld [vmem:[#allocation20 + $0x80] sm:$0xff] }
 0x168   :  { %539 = vmatpush.bf16.msra.mxu2 %v513_v57 }
 0x169   :  { %394 = vmatmul.bf16.vlgmr.msra.gmra.mxu0 %v357_v59  ;;  %v488_v59 = vld [vmem:[#allocation20 + $0x90] sm:$0xff] }
 0x1e6   :  { %v395_v61 = vpop.f32.mrf.mxu0 }
 0x1e7   :  { %v396_v62 = vadd.f32 %v762_v60, %v395_v61  ;;  %v487_v60 = vld [vmem:[#allocation20 + $0x88] sm:$0xff]  ;;  %v510_v61 = vpack.c.bf16 %v488_v59, %v486_v58  ;;  %v551_v58 = vand.u32 127, %v291_v40 }
 0x1e9   :  { %v400_v63 = vmul.f32 0.70710677, %v396_v62  ;;  %v399_v33 = vmul.f32 0.5, %v396_v62  ;;  %v489_v62 = vld [vmem:[#allocation20 + $0x98] sm:$0xff]  ;;  %527 = vmatpush.bf16.msra.mxu1 %v510_v61  ;;  %v307_v61 = vstv %s707_s20 }
 0x1eb   :  { %v403_v0 = vand.u32 2147483647, %v400_v63  ;;  %vm401_vm8 = vcmp.ge.f32.partialorder %v400_v63, 0.0  ;;  %v511_v63 = vpack.c.bf16 %v489_v62, %v487_v60  ;;  %v299_v60 = vstv %s298_s6 }
 0x1ec   :  { %v402_v31 = vsel %vm401_vm8, 1.0, %v1065_v30  ;;  %v315_v62 = vstv %s709_s25 }
 0x1ed   :  { %v404_v1 = vmul.f32 0.3275911, %v403_v0  ;;  %v430_v13 = vsub.f32 0.0, %v403_v0  ;;  %540 = vmatpush.bf16.msra.mxu2 %v511_v63  ;;  %v300_v63 = vsel %vm293_vm12, %v299_v60, 0 }
 0x1ee   :  { %v397_v2 = vpop.f32.mrf.mxu0 }
 0x1ef   :  { %v405_v3 = vadd.f32 1.0, %v404_v1  ;;  %v431_v17 = vmul.f32 %v430_v13, %v403_v0  ;;  %v482_v0 = vld [vmem:[#allocation20 + $0x60] sm:$0xff]  ;;  %v484_v1 = vld [vmem:[#allocation20 + $0x70] sm:$0xff]  ;;  %v483_v2 = vld [vmem:[#allocation20 + $0x68] sm:$0xff] }
 0x1f0   :  { %v476_v13 = vld [vmem:[#allocation20 + $0x30] sm:$0xff] }
 0x1f1   :  { %769 = vrcp.f32 %v405_v3  ;;  %v417_v7 = vand.u32 2147483648, %v405_v3  ;;  %v415_v9 = vand.u32 2147483647, %v405_v3  ;;  %vm411_vm5 = vweird.f32 %v405_v3 }
 0x1f2   :  { %v432_v21 = vmul.f32 1.442695, %v431_v17 }
 0x1f3   :  { %v418_v11 = vor.u32 1.1754944e-38, %v417_v7  ;;  %vm416_vm7 = vcmp.eq.f32.partialorder %v415_v9, 8.507059e+37  ;;  %v480_v7 = vld [vmem:[#allocation20 + $0x50] sm:$0xff] }
 0x1f4   :  { %771 = vpow2.f32 %v432_v21  ;;  %v471_v21 = vld [vmem:[#allocation20 + $0x8] sm:$0xff] }
 0x1f7   :  { %v770_v4 = vpop.eup %769 }
 0x1f8   :  { %v407_v5 = vmul.f32 %v770_v4, %v405_v3  ;;  %vm412_vm4 = vweird.f32 %v770_v4  ;;  %v508_v3 = vpack.c.bf16 %v484_v1, %v482_v0  ;;  %v323_v0 = vstv %s711_s21 }
 0x1f9   :  { %vm413_vm6 = vmor %vm411_vm5, %vm412_vm4  ;;  %vm555_vm4 = vcmp.lt.s32.totalorder %v551_v58, 10  ;;  %vm553_vm5 = vcmp.lt.s32.totalorder %v551_v58, 2 }
 0x1fa   :  { %v408_v6 = vsub.f32 1.0, %v407_v5  ;;  %v772_v27 = vpop.eup %771  ;;  %528 = vmatpush.bf16.msra.mxu1 %v508_v3  ;;  %v331_v3 = vstv %s713_s5 }
 0x1fc   :  { %v409_v8 = vmul.f32 %v770_v4, %v408_v6  ;;  %v478_v6 = vld [vmem:[#allocation20 + $0x40] sm:$0xff] }
 0x1fd   :  { %v506_v9 = vpack.c.bf16 %v480_v7, %v478_v6 }
 0x1fe   :  { %v410_v10 = vadd.f32 %v770_v4, %v409_v8  ;;  %v479_v8 = vld [vmem:[#allocation20 + $0x48] sm:$0xff] }
 0x1ff   :  { %529 = vmatpush.bf16.msra.mxu1 %v506_v9  ;;  %v347_v9 = vstv %s717_s22 }
 0x200   :  { %v414_v12 = vsel %vm413_vm6, %v770_v4, %v410_v10  ;;  %v485_v4 = vld [vmem:[#allocation20 + $0x78] sm:$0xff] }
 0x201   :  { %v419_v14 = vsel %vm416_vm7, %v418_v11, %v414_v12  ;;  %v509_v5 = vpack.c.bf16 %v485_v4, %v483_v2  ;;  %v481_v10 = vld [vmem:[#allocation20 + $0x58] sm:$0xff]  ;;  %v474_v12 = vld [vmem:[#allocation20 + $0x20] sm:$0xff]  ;;  %v308_v2 = vsel %vm301_vm13, %v307_v61, %v300_v63 }
 0x202   :  { %v421_v15 = vmul.f32 1.0614054, %v419_v14  ;;  %v507_v11 = vpack.c.bf16 %v481_v10, %v479_v8  ;;  %v316_v4 = vsel %vm309_vm14, %v315_v62, %v308_v2 }
 0x203   :  { %541 = vmatpush.bf16.msra.mxu2 %v509_v5  ;;  %v339_v5 = vstv %s715_s8  ;;  %v324_v8 = vsel %vm317_vm15, %v323_v0, %v316_v4 }
 0x204   :  { %v422_v16 = vadd.f32 -1.4531521, %v421_v15  ;;  %v504_v15 = vpack.c.bf16 %v476_v13, %v474_v12  ;;  %v332_v10 = vsel %vm325_vm0, %v331_v3, %v324_v8  ;;  %v552_v12 = vadd.s32 128, %v551_v58 }
 0x206   :  { %v423_v19 = vmul.f32 %v422_v16, %v419_v14  ;;  %v477_v16 = vld [vmem:[#allocation20 + $0x38] sm:$0xff]  ;;  %530 = vmatpush.bf16.msra.mxu1 %v504_v15  ;;  %v340_v15 = vsel %vm333_vm1, %v339_v5, %v332_v10 }
 0x207   :  { %542 = vmatpush.bf16.msra.mxu2 %v507_v11  ;;  %v355_v11 = vstv %s719_s0 }
 0x208   :  { %v424_v20 = vadd.f32 1.4214138, %v423_v19  ;;  %v470_v19 = vld [vmem:[#allocation20] sm:$0xff] }
 0x20a   :  { %v425_v22 = vmul.f32 %v424_v20, %v419_v14  ;;  %v472_v20 = vld [vmem:[#allocation20 + $0x10] sm:$0xff] }
 0x20c   :  { %v426_v23 = vadd.f32 -0.28449672, %v425_v22  ;;  %v473_v22 = vld [vmem:[#allocation20 + $0x18] sm:$0xff] }
 0x20e   :  { %v427_v24 = vmul.f32 %v426_v23, %v419_v14  ;;  %v502_v23 = vpack.c.bf16 %v472_v20, %v470_v19 }
 0x210   :  { %v428_v25 = vadd.f32 0.2548296, %v427_v24  ;;  %v503_v24 = vpack.c.bf16 %v473_v22, %v471_v21  ;;  %531 = vmatpush.bf16.msra.mxu1 %v502_v23  ;;  %v1066_v23 = vmov 0.0  }
 0x212   :  { %v429_v26 = vmul.f32 %v428_v25, %v419_v14  ;;  %v475_v14 = vld [vmem:[#allocation20 + $0x28] sm:$0xff] }
 0x213   :  { %v505_v17 = vpack.c.bf16 %v477_v16, %v475_v14  ;;  %v348_v16 = vsel %vm341_vm2, %v347_v9, %v340_v15 }
 0x214   :  { %v434_v28 = vmul.f32 %v772_v27, %v429_v26  ;;  %v356_v19 = vsel %vm349_vm3, %v355_v11, %v348_v16 }
 0x215   :  { %543 = vmatpush.bf16.msra.mxu2 %v505_v17  ;;  %vm572_vm6 = vcmp.eq.s32.totalorder %v551_v58, %v356_v19  ;;  %vm573_vm7 = vcmp.eq.s32.totalorder %v552_v12, %v356_v19 }
 0x216   :  { %v435_v29 = vsub.f32 1.0, %v434_v28 }
 0x218   :  { %v436_v32 = vmul.f32 %v435_v29, %v402_v31 }
 0x219   :  { %544 = vmatpush.bf16.msra.mxu2 %v503_v24  ;;  %v722_v24 = vsel %vm572_vm6, 1.0, %v1066_v23 }
 0x21a   :  { %v437_v34 = vadd.f32 1.0, %v436_v32 }
 0x21c   :  { %v438_v35 = vmul.f32 %v437_v34, %v399_v33  ;;  %v763_v34 = vld [vmem:[%s1256_s9] ss:$0 sm:$0xff]  ;;  %s712_s9 = sld [smem:[#allocation7 + $0x4]] }
 0x21e   :  { %439 = vadd.xlane.f32.xlu1 %v438_v35 }
 0x222   :  { %s327_s24 = scvt.s32.f32 %s712_s9 }
 0x224   :  { %v328_v50 = vstv %s327_s24 }
 0x291   :  { %v440_v42 = vpop.xlane.xlu1 %439 }
 0x292   :  { %v441_v43 = vmul.f32 %v440_v42, %v1185_v18  ;;  %v296_v42 = vstv %s295_s23 }
 0x294   :  { %v1190_v44 = vsub.f32 %v438_v35, %v441_v43  ;;  %v297_v43 = vsel %vm293_vm12, %v296_v42, 0.0  ;;  %vm635_vm12 = vcmask 7168  }
 0x296   :  { %v443_v45 = vmul.f32 %v1190_v44, %v1190_v44 }
 0x298   :  { %444 = vadd.xlane.f32.xlu1 %v443_v45 }
 0x30b   :  { %v445_v25 = vpop.xlane.xlu1 %444 }
 0x30c   :  { %v446_v26 = vmul.f32 %v445_v25, %v1185_v18  ;;  %v723_v25 = vsel %vm573_vm7, 1.0, %v1066_v23 }
 0x30e   :  { %v447_v27 = vadd.f32 1e-07, %v446_v26 }
 0x310   :  { %773 = vrsqrt.f32 %v447_v27  ;;  %vm454_vm10 = vweird.f32 %v447_v27 }
 0x316   :  { %v774_v28 = vpop.eup %773 }
 0x317   :  { %v449_v29 = vmul.f32 %v774_v28, %v447_v27  ;;  %vm455_vm9 = vweird.f32 %v774_v28 }
 0x318   :  { %vm456_vm11 = vmor %vm454_vm10, %vm455_vm9 }
 0x319   :  { %v450_v30 = vmul.f32 %v774_v28, %v449_v29 }
 0x31b   :  { %v451_v31 = vmul.f32 0.5, %v450_v30 }
 0x31d   :  { %v452_v32 = vsub.f32 1.5, %v451_v31 }
 0x31f   :  { %v453_v33 = vmul.f32 %v774_v28, %v452_v32 }
 0x321   :  { %v457_v35 = vsel %vm456_vm11, %v774_v28, %v453_v33  ;;  %v518_v28 = vld [vmem:[%s1259_s12] sm:$0x3]  ;;  %s1067_s12 = smov [#allocation21]  }
 0x322   :  { %v458_v36 = vmul.f32 %v457_v35, %v1190_v44  ;;  %v304_v44 = vstv %s303_s3  ;;  %v520_v35 = vperm.slane %v518_v28, 0  ;;  %v521_v40 = vperm.slane %v518_v28, 1  ;;  %s654_s26 = sshll.u32 %s1067_s12, 4  ;;  %s655_s26 = int_to_ptr.vmem [resolvable:$true] %s654_s26 }
 0x323   :  { %v305_v45 = vsel %vm301_vm13, %v304_v44, %v297_v43 }
 0x324   :  { %v463_v18 = vmul.f32 %v763_v34, %v458_v36  ;;  %v313_v47 = vsel %vm309_vm14, %v312_v46, %v305_v45 }
 0x325   :  { %v321_v49 = vsel %vm317_vm15, %v320_v48, %v313_v47 }
 0x326   :  { %v468_v38 = vadd.f32 %v764_v37, %v463_v18  ;;  %v329_v51 = vsel %vm325_vm0, %v328_v50, %v321_v49 }
 0x327   :  { %v337_v53 = vsel %vm333_vm1, %v336_v52, %v329_v51 }
 0x328   :  { %v469_v39 = vpack.c.bf16 %v468_v38, %v468_v38  ;;  %v345_v55 = vsel %vm341_vm2, %v344_v54, %v337_v53 }
 0x329   :  { %v353_v57 = vsel %vm349_vm3, %v352_v56, %v345_v55 }
 0x32a   :  { %532 = vmatmul.bf16.vlgmr.msra.gmra.mxu1 %v469_v39  ;;  %545 = vmatmul.bf16.vlgmr.msra.gmra.mxu2 %v469_v39  ;;  %v557_v59 = vsub.f32 0.0, %v353_v57  ;;  %v583_v6 = vadd.f32 1.0, %v353_v57  ;;  %v585_v7 = vsub.f32 1.0, %v353_v57  ;;  %v563_v22 = vmax.f32 %v353_v57, 0.0 }
 0x32c   :  { %v558_v1 = vsel %vm555_vm4, %v557_v59, %v353_v57  ;;  %v584_v13 = vmul.f32 0.8, %v583_v6  ;;  %v579_v30 = vsub.f32 %v563_v22, %v723_v25  ;;  %v721_v38 = vadd.f32 -1.0, %v563_v22 }
 0x32d   :  { %v560_v14 = vsel %vm553_vm5, -1.0, %v558_v1 }
 0x32e   :  { %v586_v17 = vadd.f32 %v585_v7, %v584_v13  ;;  %v562_v20 = vmax.f32 %v560_v14, 0.0  ;;  %v567_v41 = vmul.f32 1000000.0, %v721_v38 }
 0x330   :  { %v587_v21 = vmul.f32 0.5, %v586_v17  ;;  %v578_v29 = vsub.f32 %v562_v20, %v722_v24  ;;  %v720_v32 = vadd.f32 -1.0, %v562_v20 }
 0x332   :  { %v588_v26 = vmul.f32 %v722_v24, %v587_v21  ;;  %v589_v27 = vmul.f32 %v723_v25, %v587_v21  ;;  %v590_v31 = vsub.f32 1.0, %v587_v21  ;;  %v566_v36 = vmul.f32 1000000.0, %v720_v32 }
 0x333   :  { %v580_v48 = vadd.f32 %v579_v30, %v578_v29 }
 0x334   :  { %v591_v33 = vmul.f32 %v590_v31, %v578_v29  ;;  %v592_v34 = vmul.f32 %v590_v31, %v579_v30 }
 0x3a7   :  { %v533_v37 = vpop.f32.mrf.mxu1 }
 0x3a8   :  { %v534_v18 = vadd.f32 %v533_v37, %v520_v35 }
 0x3aa   :  { %v568_v39 = vadd.f32 %v566_v36, %v534_v18 }
 0x3ac   :  { %570 = vst [vmem:[#allocation21] sm:$0xff] %v568_v39 }
 0x3ad   :  { %v546_v42 = vpop.f32.mrf.mxu2 }
 0x3ae   :  { %v547_v43 = vadd.f32 %v546_v42, %v521_v40 }
 0x3af   :  { %v535_v44 = vpop.f32.mrf.mxu1 }
 0x3b0   :  { %v569_v45 = vadd.f32 %v567_v41, %v547_v43 }
 0x3b2   :  { %571 = vst [vmem:[#allocation21 + $0x8] sm:$0xff] %v569_v45  ;;  %v612_v46 = vmax.f32 %v568_v39, %v569_v45 }
 0x3b3   :  { %659 = dma.vmem_to_hbm [thread:$0]  %s655_s26, 256, %s657_s2, [#allocation10]  }
 0x3b4   :  { %613 = vmax.xlane.f32.xlu2 %v612_v46 }
 0x3b5   :  { %v548_v47 = vpop.f32.mrf.mxu2 }
 0x3bc   :  { %581 = vadd.xlane.f32.xlu2 %v580_v48 }
 0x427   :  { %v614_v49 = vpop.xlane.xlu2 %613 }
 0x428   :  { %v615_v50 = vsub.f32 %v568_v39, %v614_v49  ;;  %v616_v51 = vsub.f32 %v569_v45, %v614_v49 }
 0x42a   :  { %v617_v52 = vmul.f32 1.442695, %v615_v50  ;;  %v619_v53 = vmul.f32 1.442695, %v616_v51 }
 0x42c   :  { %775 = vpow2.f32 %v617_v52 }
 0x42d   :  { %777 = vpow2.f32 %v619_v53 }
 0x42f   :  { %v582_v57 = vpop.xlane.xlu2 %581 }
 0x430   :  { %779 = vrcp.f32 %v582_v57  ;;  %v604_v62 = vand.u32 2147483648, %v582_v57  ;;  %vm598_vm8 = vweird.f32 %v582_v57  ;;  %v602_v63 = vand.u32 2147483647, %v582_v57 }
 0x432   :  { %v776_v54 = vpop.eup %775  ;;  %v605_v1 = vor.u32 1.1754944e-38, %v604_v62  ;;  %vm603_vm11 = vcmp.eq.f32.partialorder %v602_v63, 8.507059e+37 }
 0x433   :  { %v778_v55 = vpop.eup %777 }
 0x434   :  { %v621_v56 = vadd.f32 %v778_v55, %v776_v54 }
 0x436   :  { %622 = vadd.xlane.f32.xlu0 %v621_v56  ;;  %v780_v58 = vpop.eup %779 }
 0x437   :  { %v594_v59 = vmul.f32 %v780_v58, %v582_v57  ;;  %vm599_vm9 = vweird.f32 %v780_v58 }
 0x438   :  { %vm600_vm10 = vmor %vm598_vm8, %vm599_vm9 }
 0x439   :  { %v595_v60 = vsub.f32 1.0, %v594_v59 }
 0x43b   :  { %v596_v61 = vmul.f32 %v780_v58, %v595_v60 }
 0x43d   :  { %v597_v0 = vadd.f32 %v780_v58, %v596_v61 }
 0x43f   :  { %v601_v2 = vsel %vm600_vm10, %v780_v58, %v597_v0 }
 0x440   :  { %v606_v3 = vsel %vm603_vm11, %v605_v1, %v601_v2 }
 0x441   :  { %v608_v4 = vmul.f32 %v606_v3, %v591_v33  ;;  %v609_v5 = vmul.f32 %v606_v3, %v592_v34 }
 0x443   :  { %v610_v6 = vadd.f32 %v608_v4, %v588_v26  ;;  %v611_v7 = vadd.f32 %v609_v5, %v589_v27 }
 0x4a9   :  { %v623_v8 = vpop.xlane.xlu0 %622 }
 0x4aa   :  { %781 = vlog2.f32 %v623_v8 }
 0x4b0   :  { %v782_v9 = vpop.eup %781 }
 0x4b1   :  { %v625_v10 = vmul.f32 0.6931472, %v782_v9 }
 0x4b3   :  { %v626_v11 = vadd.f32 %v625_v10, %v614_v49 }
 0x4b5   :  { %v627_v12 = vsub.f32 %v568_v39, %v626_v11  ;;  %v628_v13 = vsub.f32 %v569_v45, %v626_v11 }
 0x4b7   :  { %v629_v14 = vmul.f32 %v627_v12, %v610_v6  ;;  %v630_v15 = vmul.f32 %v628_v13, %v611_v7 }
 0x4b9   :  { %v631_v16 = vadd.f32 %v630_v15, %v629_v14 }
 0x4bb   :  { %632 = vadd.xlane.f32.xlu1 %v631_v16 }
 0x52e   :  { %v633_v17 = vpop.xlane.xlu1 %632 }
 0x52f   :  { %v634_v19 = vsub.f32 0.0, %v633_v17 }
 0x531   :  { %v636_v20 = vsel %vm635_vm12, %v634_v19, 0.0 }
 0x532   :  { %637 = vadd.xlane.f32.xlu2 %v636_v20 }
 0x5a5   :  { %v638_v21 = vpop.xlane.xlu2 %637 }
 0x5a6   :  { %v639_v22 = vrot.slane %v638_v21, 4 }
 0x5a8   :  { %v640_v23 = vadd.f32 %v639_v22, %v638_v21 }
 0x5aa   :  { %v641_v24 = vrot.slane %v640_v23, 2 }
 0x5ac   :  { %v642_v25 = vadd.f32 %v641_v24, %v640_v23 }
 0x5ae   :  { %v643_v26 = vrot.slane %v642_v25, 1 }
 0x5b0   :  { %v644_v27 = vadd.f32 %v643_v26, %v642_v25 }
 0x5b2   :  { %738 = vpush %v644_v27 }
 0x5e3   :  { %s739_s3 = spop %738 }
 0x5e4   :  { %s646_s9 = smul.f32 0.125, %s739_s3 }
 0x5e6   :  { %648 = sst [smem:[#allocation22]] %s646_s9 }
 0x5e7   :  { %668 = dma.smem_to_hbm %s1068_s13, 16, %s666_s28, [#allocation11]  }
 0x5e8   :  { %1045 = dma.done.wait [#allocation10], 256  }
 0x5e9   :  { %1046 = vsyncadd [#allocation10], 4294967040 }
 0x5ea   :  { %1047 = dma.done.wait [#allocation11], 16  }
 0x5eb   :  { %1048 = vsyncadd [#allocation11], 4294967280 }
 0x5ec   :  { %677 = sfence }
 0x5ed   :  { %678 = vsyncpa [#allocation9], 1 }
 0x5ee   :  { %679 = vsyncpa [#allocation13], 1 }
 0x5ef   :  { %680 = vsyncpa [#allocation16], 1 }
 0x5f0   :  { %681 = vsyncpa [#allocation19], 1 }
 0x5f1   :  { %682 = vsyncpa [#allocation10], 1 }
 0x5f2   :  { %683 = vsyncpa [#allocation11], 1 }

</bundles_post_ra>
